<compile_context>
chip_gen: v7x
topology: tpu7x:2x2x1
jax: 0.10.0
libtpu: 0.0.40
codegen_flags: <defaults>
</compile_context>

<pallas_src>
import math
import functools

import jax
import jax.numpy as jnp
from jax import lax
from jax.experimental import pallas as pl
from jax.experimental.pallas import tpu as pltpu


# --------------------------------- kernels ----------------------------------

def qkv_proj_kernel(qk_ref, src_ref, wqk_ref, bqk_ref, wv_ref, bv_ref,
                    q_ref, k_ref, v_ref):
    """Fused q|k projection + v projection for one (tp, D) sequence tile.

    Outputs are lane-dense (tp, D) bf16 tiles (softmax scale already folded
    into the q half of wqk/bqk at parameter-prep time).
    """
    f32 = jnp.float32
    qk2 = jnp.dot(qk_ref[0], wqk_ref[...], preferred_element_type=f32) + bqk_ref[...]
    v2 = jnp.dot(src_ref[0], wv_ref[...], preferred_element_type=f32) + bv_ref[...]
    D = v2.shape[-1]
    q_ref[0] = qk2[:, :D].astype(q_ref.dtype)
    k_ref[0] = qk2[:, D:].astype(k_ref.dtype)
    v_ref[0] = v2.astype(v_ref.dtype)


def flash_encoder_kernel(q_ref, k_ref, v_ref, src_ref,
                         wo_ref, bo_ref, ln1w_ref, ln1b_ref,
                         w1_ref, b1_ref, w2_ref, b2_ref,
                         ln2w_ref, ln2b_ref,
                         out_ref,
                         m_scr, l_scr, acc_scr,
                         *, nhead: int):
    """Online-softmax attention over k tiles + out-proj + LN1 + FFN + LN2.

    Grid: (batch, q-tiles, k-tiles).  The k axis is the "arbitrary" reduction
    axis; m/l/acc persist in VMEM scratch across its steps and the epilogue
    (out-proj, residuals, layernorms, FFN) runs only on the last k step.
    """
    f32 = jnp.float32
    bf16 = jnp.bfloat16
    eps = 1e-5
    ki = pl.program_id(2)

    @pl.when(ki == 0)
    def _init():
        m_scr[...] = jnp.full(m_scr.shape, -jnp.inf, f32)
        l_scr[...] = jnp.zeros(l_scr.shape, f32)
        acc_scr[...] = jnp.zeros(acc_scr.shape, f32)

    qh = q_ref[0]     # (H, tq, hd) bf16 -- resident across the k axis
    kh = k_ref[0]     # (H, tk, hd) bf16
    vh = v_ref[0]     # (H, tk, hd) bf16

    s = jnp.einsum('hqd,hkd->hqk', qh, kh, preferred_element_type=f32)
    m_prev = m_scr[...]
    m_new = jnp.maximum(m_prev, jnp.max(s, axis=-1, keepdims=True))
    alpha = jnp.exp(m_prev - m_new)
    p = jnp.exp(s - m_new)
    l_scr[...] = alpha * l_scr[...] + jnp.sum(p, axis=-1, keepdims=True)
    acc_scr[...] = alpha * acc_scr[...] + jnp.einsum(
        'hqk,hkd->hqd', p.astype(bf16), vh, preferred_element_type=f32)
    m_scr[...] = m_new

    @pl.when(ki == pl.num_programs(2) - 1)
    def _finalize():
        # Exact reciprocal (one divide per row): negligible cost, tighter accuracy.
        ctx = (acc_scr[...] * (1.0 / l_scr[...])).astype(bf16)     # (H, tq, hd)

        # Head merge folded into the output projection: attn = sum_h ctx_h @ Wo_h
        # (avoids any in-kernel concat/relayout; wo_ref is (H, hd, D)).
        attn = jnp.dot(ctx[0], wo_ref[0], preferred_element_type=f32)
        for h in range(1, nhead):
            attn = attn + jnp.dot(ctx[h], wo_ref[h], preferred_element_type=f32)
        attn = attn + bo_ref[...]

        # residual + layernorm1 (f32, rsqrt on EUP)
        x1 = src_ref[0] + attn
        mu1 = jnp.mean(x1, axis=-1, keepdims=True)
        var1 = jnp.mean((x1 - mu1) ** 2, axis=-1, keepdims=True)
        y1 = (x1 - mu1) * lax.rsqrt(var1 + eps) * ln1w_ref[...] + ln1b_ref[...]

        # feed-forward: linear2(relu(linear1(y1))); (tq, F) activation kept bf16
        h1 = jnp.dot(y1.astype(bf16), w1_ref[...],
                     preferred_element_type=f32) + b1_ref[...]
        h1 = jnp.maximum(h1, 0.0).astype(bf16)
        ffn = jnp.dot(h1, w2_ref[...], preferred_element_type=f32) + b2_ref[...]

        # residual + layernorm2
        x2 = y1 + ffn
        mu2 = jnp.mean(x2, axis=-1, keepdims=True)
        var2 = jnp.mean((x2 - mu2) ** 2, axis=-1, keepdims=True)
        y2 = (x2 - mu2) * lax.rsqrt(var2 + eps) * ln2w_ref[...] + ln2b_ref[...]
        out_ref[0] = y2.astype(out_ref.dtype)


# --------------------------------- helpers ----------------------------------

def _pick_tile(n, target):
    """Largest tile <= target that divides n and is a multiple of 8 (or n itself)."""
    if n <= target:
        return n
    for t in range(target, 7, -1):
        if n % t == 0 and t % 8 == 0:
            return t
    return n


def _vmem_limit_bytes():
    """~75% of physical VMEM: ~48 MiB on v7x, ~96 MiB on v5e/v6e."""
    try:
        cap = pltpu.get_tpu_info().vmem_capacity_bytes
        return int(min(cap * 3 // 4, 112 * 1024 * 1024))
    except Exception:
        return 48 * 1024 * 1024


def _const_spec(shape, index_map, pipeline_mode):
    if pipeline_mode is None:
        return pl.BlockSpec(shape, index_map)
    return pl.BlockSpec(shape, index_map, pipeline_mode=pipeline_mode)


def prepare_kernel_params(params, *, nhead):
    """One-time prep: fuse q|k, fold softmax scale into q (f32 bias), bf16 weights,
    and reshape Wo to (H, hd, D) so the head-merge folds into the out-projection."""
    D = params["wo"].shape[0]
    hd = D // nhead
    scale = 1.0 / math.sqrt(hd)
    bf16 = jnp.bfloat16
    wqkv, bqkv = params["wqkv"], params["bqkv"]

    wqk = jnp.concatenate([wqkv[:, :D] * scale, wqkv[:, D:2 * D]], axis=1)
    bqk = jnp.concatenate([bqkv[:, :D] * scale, bqkv[:, D:2 * D]], axis=1)

    return {
        "wqk": wqk.astype(bf16), "bqk": bqk,                        # (D,2D), (1,2D)
        "wv": wqkv[:, 2 * D:].astype(bf16), "bv": bqkv[:, 2 * D:],  # (D,D),  (1,D)
        "wo_h": params["wo"].reshape(nhead, hd, D).astype(bf16),    # (H,hd,D)
        "bo": params["bo"],
        "ln1w": params["ln1w"], "ln1b": params["ln1b"],
        "w1": params["w1"].astype(bf16), "b1": params["b1"],
        "w2": params["w2"].astype(bf16), "b2": params["b2"],
        "ln2w": params["ln2w"], "ln2b": params["ln2b"],
    }


# --------------------------------- wrappers ---------------------------------

def _encoder_layer_bsd(src_bsd, pos_bsd, kp, *, nhead, tq, tk,
                       single_buffer_weights):
    B, S, D = src_bsd.shape
    assert D % nhead == 0
    hd = D // nhead
    F = kp["w1"].shape[1]
    tq = _pick_tile(S, 256) if tq is None else tq
    tk = _pick_tile(S, 512) if tk is None else tk
    assert S % tq == 0 and S % tk == 0, (S, tq, tk)

    bf16 = jnp.bfloat16
    vmem_limit = _vmem_limit_bytes()
    # Single-buffer constant-index weights (their index never changes across the grid).
    wmode = pl.Buffered(1) if single_buffer_weights else None

    # pos is only ever consumed as (src + pos) -> bf16 matmul input.
    qk_bf = (src_bsd + pos_bsd).astype(bf16)
    src_bf = src_bsd.astype(bf16)

    # ---------------- kernel 1: fused q|k and v projections -----------------
    tp = tk
    seq_bf_spec = pl.BlockSpec((1, tp, D), lambda b, i: (b, i, 0))
    c2 = lambda shape: _const_spec(shape, lambda b, i: (0,) * len(shape), wmode)

    q_flat, k_flat, v_flat = pl.pallas_call(
        qkv_proj_kernel,
        out_shape=(jax.ShapeDtypeStruct((B, S, D), bf16),) * 3,
        grid_spec=pltpu.PrefetchScalarGridSpec(
            num_scalar_prefetch=0,
            grid=(B, S // tp),
            in_specs=[seq_bf_spec, seq_bf_spec,
                      c2((D, 2 * D)), c2((1, 2 * D)),
                      c2((D, D)), c2((1, D))],
            out_specs=[seq_bf_spec, seq_bf_spec, seq_bf_spec],
        ),
        compiler_params=pltpu.CompilerParams(
            dimension_semantics=("parallel", "parallel"),
            vmem_limit_bytes=vmem_limit),
    )(qk_bf, src_bf, kp["wqk"], kp["bqk"], kp["wv"], kp["bv"])

    # Head split (B,S,D) -> (B,H,S,hd): one XLA transpose per tensor, done once
    # between the two pallas_calls so the flash loop stays relayout-free.
    def to_heads(t):
        return t.reshape(B, S, nhead, hd).transpose(0, 2, 1, 3)
    q_hm, k_hm, v_hm = to_heads(q_flat), to_heads(k_flat), to_heads(v_flat)

    # ---------- kernel 2: flash attention + out-proj + LN1 + FFN + LN2 ------
    nq, nk = S // tq, S // tk
    q_spec = pl.BlockSpec((1, nhead, tq, hd), lambda b, qi, ki: (b, 0, qi, 0))
    kv_spec = pl.BlockSpec((1, nhead, tk, hd), lambda b, qi, ki: (b, 0, ki, 0))
    row_spec = pl.BlockSpec((1, tq, D), lambda b, qi, ki: (b, qi, 0))
    c3 = lambda shape: _const_spec(shape, lambda b, qi, ki: (0,) * len(shape), wmode)

    flops = B * (4 * S * S * D + 2 * S * D * D + 4 * S * D * F)
    bytes_acc = (B * nq * 2 * S * D * 2        # k/v bf16 re-read per q tile
                 + B * S * D * (2 + 4 + 4)     # q bf16, src f32, out f32
                 + 2 * (D * D + 2 * D * F)     # bf16 weights
                 + 4 * (7 * D + F))            # f32 biases / LN params
    cost = pl.CostEstimate(flops=flops,
                           transcendentals=B * nhead * S * S,
                           bytes_accessed=bytes_acc)

    return pl.pallas_call(
        functools.partial(flash_encoder_kernel, nhead=nhead),
        out_shape=jax.ShapeDtypeStruct((B, S, D), src_bsd.dtype),
        grid_spec=pltpu.PrefetchScalarGridSpec(
            num_scalar_prefetch=0,
            grid=(B, nq, nk),
            in_specs=[q_spec, kv_spec, kv_spec, row_spec,
                      c3((nhead, hd, D)), c3((1, D)),
                      c3((1, D)), c3((1, D)),
                      c3((D, F)), c3((1, F)),
                      c3((F, D)), c3((1, D)),
                      c3((1, D)), c3((1, D))],
            out_specs=row_spec,
            scratch_shapes=[pltpu.VMEM((nhead, tq, 1), jnp.float32),   # m
                            pltpu.VMEM((nhead, tq, 1), jnp.float32),   # l
                            pltpu.VMEM((nhead, tq, hd), jnp.float32)], # acc
        ),
        compiler_params=pltpu.CompilerParams(
            dimension_semantics=("parallel", "parallel", "arbitrary"),
            vmem_limit_bytes=vmem_limit),
        cost_estimate=cost,
    )(q_hm, k_hm, v_hm, src_bsd,
      kp["wo_h"], kp["bo"], kp["ln1w"], kp["ln1b"],
      kp["w1"], kp["b1"], kp["w2"], kp["b2"],
      kp["ln2w"], kp["ln2b"])


def encoder_layer_forward_bsd(src_bsd, pos_bsd, kp, *, nhead, tq=None, tk=None):
    """Batch-first entry point: src_bsd, pos_bsd are (B, S, D)."""
    try:
        return _encoder_layer_bsd(src_bsd, pos_bsd, kp, nhead=nhead, tq=tq, tk=tk,
                                  single_buffer_weights=True)
    except Exception:
        # pl.Buffered(1) (single-buffered constant weights) not supported on this
        # JAX/Mosaic version -> fall back to default double buffering.
        return _encoder_layer_bsd(src_bsd, pos_bsd, kp, nhead=nhead, tq=tq, tk=tk,
                                  single_buffer_weights=False)


def encoder_layer_forward(src, pos, kp, *, nhead, tq=None, tk=None):
    """PyTorch-compatible seq-first interface: src, pos are (S, B, D).

    The (S,B,D)<->(B,S,D) transpose is paid once here; a stacked encoder
    should call encoder_layer_forward_bsd directly and stay batch-first.
    """
    src_bsd = jnp.transpose(src, (1, 0, 2))
    pos_bsd = jnp.transpose(pos, (1, 0, 2))
    out = encoder_layer_forward_bsd(src_bsd, pos_bsd, kp, nhead=nhead, tq=tq, tk=tk)
    return jnp.transpose(out, (1, 0, 2))


# ------------------------------ reference / test -----------------------------

def reference_forward(src, pos, params, *, nhead):
    """Pure-JAX f32 reference reproducing PyTorch forward_post (eval mode)."""
    S, B, D = src.shape
    hd = D // nhead
    scale = 1.0 / math.sqrt(hd)
    eps = 1e-5

    x = jnp.transpose(src, (1, 0, 2))         # (B, S, D)
    p = jnp.transpose(pos, (1, 0, 2))
    qk = x + p

    wqkv, bqkv = params["wqkv"], params["bqkv"][0]
    q = qk @ wqkv[:, :D] + bqkv[:D]
    k = qk @ wqkv[:, D:2 * D] + bqkv[D:2 * D]
    v = x @ wqkv[:, 2 * D:] + bqkv[2 * D:]

    def split_heads(t):
        return t.reshape(B, S, nhead, hd).transpose(0, 2, 1, 3)
    qh, kh, vh = split_heads(q) * scale, split_heads(k), split_heads(v)
    s = jnp.einsum("bhqd,bhkd->bhqk", qh, kh)
    a = jax.nn.softmax(s, axis=-1)
    ctx = jnp.einsum("bhqk,bhkd->bhqd", a, vh).transpose(0, 2, 1, 3).reshape(B, S, D)
    attn_out = ctx @ params["wo"] + params["bo"][0]

    def ln(t, w, b):
        mu = jnp.mean(t, -1, keepdims=True)
        var = jnp.mean((t - mu) ** 2, -1, keepdims=True)
        return (t - mu) / jnp.sqrt(var + eps) * w[0] + b[0]

    y1 = ln(x + attn_out, params["ln1w"], params["ln1b"])
    h = jnp.maximum(y1 @ params["w1"] + params["b1"][0], 0.0)
    ffn = h @ params["w2"] + params["b2"][0]
    y2 = ln(y1 + ffn, params["ln2w"], params["ln2b"])
    return jnp.transpose(y2, (1, 0, 2))


def make_params(key, d_model, nhead, dim_feedforward):
    ks = jax.random.split(key, 8)
    sc = 0.05
    f32 = jnp.float32
    return {
        "wqkv": jax.random.normal(ks[0], (d_model, 3 * d_model), f32) * sc,
        "bqkv": jax.random.normal(ks[1], (1, 3 * d_model), f32) * sc,
        "wo":   jax.random.normal(ks[2], (d_model, d_model), f32) * sc,
        "bo":   jax.random.normal(ks[3], (1, d_model), f32) * sc,
        "ln1w": jnp.ones((1, d_model), f32),
        "ln1b": jnp.zeros((1, d_model), f32),
        "w1":   jax.random.normal(ks[4], (d_model, dim_feedforward), f32) * sc,
        "b1":   jax.random.normal(ks[5], (1, dim_feedforward), f32) * sc,
        "w2":   jax.random.normal(ks[6], (dim_feedforward, d_model), f32) * sc,
        "b2":   jax.random.normal(ks[7], (1, d_model), f32) * sc,
        "ln2w": jnp.ones((1, d_model), f32),
        "ln2b": jnp.zeros((1, d_model), f32),
    }


if __name__ == "__main__":
    S, B, D = 32, 2, 32          # seq, batch, d_model
    NHEAD = 4
    FFN = 64                     # dim_feedforward
    TQ, TK = 8, 16               # small tiles so the flash q/k grid is exercised

    key = jax.random.PRNGKey(0)
    k_src, k_pos, k_par = jax.random.split(key, 3)
    src = jax.random.normal(k_src, (S, B, D), jnp.float32)
    pos = jax.random.normal(k_pos, (S, B, D), jnp.float32)
    params = make_params(k_par, D, NHEAD, FFN)

    # One-time parameter prep (fuse q|k, fold softmax scale, bf16 weights).
    kparams = prepare_kernel_params(params, nhead=NHEAD)

    out = encoder_layer_forward(src, pos, kparams, nhead=NHEAD, tq=TQ, tk=TK)
    out = jax.block_until_ready(out)

    ref = reference_forward(src, pos, params, nhead=NHEAD)
    assert out.shape == (S, B, D)
    max_err = jnp.max(jnp.abs(out - ref))
    # bf16 MXU inputs -> looser tolerance than pure f32.
    assert jnp.allclose(out, ref, atol=3e-2, rtol=3e-2), f"max err {max_err}"

    print("KERNEL_OK")
</pallas_src>

<mosaic_0001>
module attributes {stable_mosaic.version = 11 : i64} {
  func.func @qkv_proj_kernel(%arg0: i32, %arg1: i32, %arg2: memref<1x16x32xbf16, #tpu.memory_space<vmem>>, %arg3: memref<1x16x32xbf16, #tpu.memory_space<vmem>>, %arg4: memref<32x64xbf16, #tpu.memory_space<vmem>>, %arg5: memref<1x64xf32, #tpu.memory_space<vmem>>, %arg6: memref<32x32xbf16, #tpu.memory_space<vmem>>, %arg7: memref<1x32xf32, #tpu.memory_space<vmem>>, %arg8: memref<1x16x32xbf16, #tpu.memory_space<vmem>>, %arg9: memref<1x16x32xbf16, #tpu.memory_space<vmem>>, %arg10: memref<1x16x32xbf16, #tpu.memory_space<vmem>>) attributes {dimension_semantics = [#tpu.dimension_semantics<parallel>, #tpu.dimension_semantics<parallel>], iteration_bounds = array<i64: 2, 2>, scalar_prefetch = 0 : i64, scratch_operands = 0 : i64, tpu.core_type = #tpu.core_type<tc>, window_params = [{transform_indices = @transform_0, window_bounds = array<i64: 1, 16, 32>}, {transform_indices = @transform_1, window_bounds = array<i64: 1, 16, 32>}, {pipeline_mode = #tpu.pipeline_mode<synchronous>, transform_indices = @transform_2, window_bounds = array<i64: 32, 64>}, {pipeline_mode = #tpu.pipeline_mode<synchronous>, transform_indices = @transform_3, window_bounds = array<i64: 1, 64>}, {pipeline_mode = #tpu.pipeline_mode<synchronous>, transform_indices = @transform_4, window_bounds = array<i64: 32, 32>}, {pipeline_mode = #tpu.pipeline_mode<synchronous>, transform_indices = @transform_5, window_bounds = array<i64: 1, 32>}, {transform_indices = @transform_6, window_bounds = array<i64: 1, 16, 32>}, {transform_indices = @transform_7, window_bounds = array<i64: 1, 16, 32>}, {transform_indices = @transform_8, window_bounds = array<i64: 1, 16, 32>}]} {
    %c0 = arith.constant 0 : index
    %c0_0 = arith.constant 0 : index
    %c0_1 = arith.constant 0 : index
    %0 = vector.load %arg2[%c0, %c0_0, %c0_1] : memref<1x16x32xbf16, #tpu.memory_space<vmem>>, vector<1x16x32xbf16>
    %1 = vector.shape_cast %0 : vector<1x16x32xbf16> to vector<16x32xbf16>
    %c0_2 = arith.constant 0 : index
    %c0_3 = arith.constant 0 : index
    %2 = vector.load %arg4[%c0_2, %c0_3] : memref<32x64xbf16, #tpu.memory_space<vmem>>, vector<32x64xbf16>
    %cst = arith.constant dense<0.000000e+00> : vector<16x64xf32>
    %3 = tpu.matmul %1, %2, %cst {dimension_numbers = #tpu.dot_dimension_numbers<[1], [0], [0], [1], [0, 0, 1, 1], [], []>} : vector<16x32xbf16>, vector<32x64xbf16>, vector<16x64xf32> -> vector<16x64xf32>
    %c0_4 = arith.constant 0 : index
    %c0_5 = arith.constant 0 : index
    %4 = vector.load %arg5[%c0_4, %c0_5] : memref<1x64xf32, #tpu.memory_space<vmem>>, vector<1x64xf32>
    %5 = vector.broadcast %4 : vector<1x64xf32> to vector<16x64xf32>
    %6 = arith.addf %3, %5 : vector<16x64xf32>
    %c0_6 = arith.constant 0 : index
    %c0_7 = arith.constant 0 : index
    %c0_8 = arith.constant 0 : index
    %7 = vector.load %arg3[%c0_6, %c0_7, %c0_8] : memref<1x16x32xbf16, #tpu.memory_space<vmem>>, vector<1x16x32xbf16>
    %8 = vector.shape_cast %7 : vector<1x16x32xbf16> to vector<16x32xbf16>
    %c0_9 = arith.constant 0 : index
    %c0_10 = arith.constant 0 : index
    %9 = vector.load %arg6[%c0_9, %c0_10] : memref<32x32xbf16, #tpu.memory_space<vmem>>, vector<32x32xbf16>
    %cst_11 = arith.constant dense<0.000000e+00> : vector<16x32xf32>
    %10 = tpu.matmul %8, %9, %cst_11 {dimension_numbers = #tpu.dot_dimension_numbers<[1], [0], [0], [1], [0, 0, 1, 1], [], []>} : vector<16x32xbf16>, vector<32x32xbf16>, vector<16x32xf32> -> vector<16x32xf32>
    %c0_12 = arith.constant 0 : index
    %c0_13 = arith.constant 0 : index
    %11 = vector.load %arg7[%c0_12, %c0_13] : memref<1x32xf32, #tpu.memory_space<vmem>>, vector<1x32xf32>
    %12 = vector.broadcast %11 : vector<1x32xf32> to vector<16x32xf32>
    %13 = arith.addf %10, %12 : vector<16x32xf32>
    %14 = vector.extract_strided_slice %6 {offsets = [0, 0], sizes = [16, 32], strides = [1, 1]} : vector<16x64xf32> to vector<16x32xf32>
    %15 = arith.truncf %14 : vector<16x32xf32> to vector<16x32xbf16>
    %c0_14 = arith.constant 0 : index
    %c0_15 = arith.constant 0 : index
    %c0_16 = arith.constant 0 : index
    %16 = vector.load %arg8[%c0_14, %c0_15, %c0_16] : memref<1x16x32xbf16, #tpu.memory_space<vmem>>, vector<1x16x32xbf16>
    %17 = vector.shape_cast %16 : vector<1x16x32xbf16> to vector<16x32xbf16>
    %18 = vector.shape_cast %15 : vector<16x32xbf16> to vector<1x16x32xbf16>
    tpu.vector_store %arg8[%c0_14, %c0_15, %c0_16], %18 {strides = array<i32>} : memref<1x16x32xbf16, #tpu.memory_space<vmem>>, vector<1x16x32xbf16>,
    %19 = vector.extract_strided_slice %6 {offsets = [0, 32], sizes = [16, 32], strides = [1, 1]} : vector<16x64xf32> to vector<16x32xf32>
    %20 = arith.truncf %19 : vector<16x32xf32> to vector<16x32xbf16>
    %c0_17 = arith.constant 0 : index
    %c0_18 = arith.constant 0 : index
    %c0_19 = arith.constant 0 : index
    %21 = vector.load %arg9[%c0_17, %c0_18, %c0_19] : memref<1x16x32xbf16, #tpu.memory_space<vmem>>, vector<1x16x32xbf16>
    %22 = vector.shape_cast %21 : vector<1x16x32xbf16> to vector<16x32xbf16>
    %23 = vector.shape_cast %20 : vector<16x32xbf16> to vector<1x16x32xbf16>
    tpu.vector_store %arg9[%c0_17, %c0_18, %c0_19], %23 {strides = array<i32>} : memref<1x16x32xbf16, #tpu.memory_space<vmem>>, vector<1x16x32xbf16>,
    %24 = arith.truncf %13 : vector<16x32xf32> to vector<16x32xbf16>
    %c0_20 = arith.constant 0 : index
    %c0_21 = arith.constant 0 : index
    %c0_22 = arith.constant 0 : index
    %25 = vector.load %arg10[%c0_20, %c0_21, %c0_22] : memref<1x16x32xbf16, #tpu.memory_space<vmem>>, vector<1x16x32xbf16>
    %26 = vector.shape_cast %25 : vector<1x16x32xbf16> to vector<16x32xbf16>
    %27 = vector.shape_cast %24 : vector<16x32xbf16> to vector<1x16x32xbf16>
    tpu.vector_store %arg10[%c0_20, %c0_21, %c0_22], %27 {strides = array<i32>} : memref<1x16x32xbf16, #tpu.memory_space<vmem>>, vector<1x16x32xbf16>,
    return
  }
  func.func @transform_0(%arg0: i32, %arg1: i32) -> (i32, i32, i32) {
    %c0_i32 = arith.constant 0 : i32
    %c0_i32_0 = arith.constant 0 : i32
    return %arg0, %arg1, %c0_i32 : i32, i32, i32
  }
  func.func @transform_1(%arg0: i32, %arg1: i32) -> (i32, i32, i32) {
    %c0_i32 = arith.constant 0 : i32
    %c0_i32_0 = arith.constant 0 : i32
    return %arg0, %arg1, %c0_i32 : i32, i32, i32
  }
  func.func @transform_2(%arg0: i32, %arg1: i32) -> (i32, i32) {
    %c0_i32 = arith.constant 0 : i32
    %c0_i32_0 = arith.constant 0 : i32
    %c0_i32_1 = arith.constant 0 : i32
    return %c0_i32, %c0_i32_0 : i32, i32
  }
  func.func @transform_3(%arg0: i32, %arg1: i32) -> (i32, i32) {
    %c0_i32 = arith.constant 0 : i32
    %c0_i32_0 = arith.constant 0 : i32
    %c0_i32_1 = arith.constant 0 : i32
    return %c0_i32, %c0_i32_0 : i32, i32
  }
  func.func @transform_4(%arg0: i32, %arg1: i32) -> (i32, i32) {
    %c0_i32 = arith.constant 0 : i32
    %c0_i32_0 = arith.constant 0 : i32
    %c0_i32_1 = arith.constant 0 : i32
    return %c0_i32, %c0_i32_0 : i32, i32
  }
  func.func @transform_5(%arg0: i32, %arg1: i32) -> (i32, i32) {
    %c0_i32 = arith.constant 0 : i32
    %c0_i32_0 = arith.constant 0 : i32
    %c0_i32_1 = arith.constant 0 : i32
    return %c0_i32, %c0_i32_0 : i32, i32
  }
  func.func @transform_6(%arg0: i32, %arg1: i32) -> (i32, i32, i32) {
    %c0_i32 = arith.constant 0 : i32
    %c0_i32_0 = arith.constant 0 : i32
    return %arg0, %arg1, %c0_i32 : i32, i32, i32
  }
  func.func @transform_7(%arg0: i32, %arg1: i32) -> (i32, i32, i32) {
    %c0_i32 = arith.constant 0 : i32
    %c0_i32_0 = arith.constant 0 : i32
    return %arg0, %arg1, %c0_i32 : i32, i32, i32
  }
  func.func @transform_8(%arg0: i32, %arg1: i32) -> (i32, i32, i32) {
    %c0_i32 = arith.constant 0 : i32
    %c0_i32_0 = arith.constant 0 : i32
    return %arg0, %arg1, %c0_i32 : i32, i32, i32
  }
}

module attributes {stable_mosaic.version = 11 : i64} {
  func.func @qkv_proj_kernel(%arg0: i32, %arg1: i32, %arg2: memref<1x16x32xbf16, #tpu.memory_space<vmem>>, %arg3: memref<1x16x32xbf16, #tpu.memory_space<vmem>>, %arg4: memref<32x64xbf16, #tpu.memory_space<vmem>>, %arg5: memref<1x64xf32, #tpu.memory_space<vmem>>, %arg6: memref<32x32xbf16, #tpu.memory_space<vmem>>, %arg7: memref<1x32xf32, #tpu.memory_space<vmem>>, %arg8: memref<1x16x32xbf16, #tpu.memory_space<vmem>>, %arg9: memref<1x16x32xbf16, #tpu.memory_space<vmem>>, %arg10: memref<1x16x32xbf16, #tpu.memory_space<vmem>>) attributes {dimension_semantics = [#tpu.dimension_semantics<parallel>, #tpu.dimension_semantics<parallel>], iteration_bounds = array<i64: 2, 2>, scalar_prefetch = 0 : i64, scratch_operands = 0 : i64, tpu.core_type = #tpu.core_type<tc>, window_params = [{transform_indices = @transform_0, window_bounds = array<i64: 1, 16, 32>}, {transform_indices = @transform_1, window_bounds = array<i64: 1, 16, 32>}, {pipeline_mode = #tpu.pipeline_mode<synchronous>, transform_indices = @transform_2, window_bounds = array<i64: 32, 64>}, {pipeline_mode = #tpu.pipeline_mode<synchronous>, transform_indices = @transform_3, window_bounds = array<i64: 1, 64>}, {pipeline_mode = #tpu.pipeline_mode<synchronous>, transform_indices = @transform_4, window_bounds = array<i64: 32, 32>}, {pipeline_mode = #tpu.pipeline_mode<synchronous>, transform_indices = @transform_5, window_bounds = array<i64: 1, 32>}, {transform_indices = @transform_6, window_bounds = array<i64: 1, 16, 32>}, {transform_indices = @transform_7, window_bounds = array<i64: 1, 16, 32>}, {transform_indices = @transform_8, window_bounds = array<i64: 1, 16, 32>}]} {
    %c0 = arith.constant 0 : index
    %c0_0 = arith.constant 0 : index
    %c0_1 = arith.constant 0 : index
    %0 = vector.load %arg2[%c0, %c0_0, %c0_1] : memref<1x16x32xbf16, #tpu.memory_space<vmem>>, vector<1x16x32xbf16>
    %1 = vector.shape_cast %0 : vector<1x16x32xbf16> to vector<16x32xbf16>
    %c0_2 = arith.constant 0 : index
    %c0_3 = arith.constant 0 : index
    %2 = vector.load %arg4[%c0_2, %c0_3] : memref<32x64xbf16, #tpu.memory_space<vmem>>, vector<32x64xbf16>
    %cst = arith.constant dense<0.000000e+00> : vector<16x64xf32>
    %3 = tpu.matmul %1, %2, %cst {dimension_numbers = #tpu.dot_dimension_numbers<[1], [0], [0], [1], [0, 0, 1, 1], [], []>} : vector<16x32xbf16>, vector<32x64xbf16>, vector<16x64xf32> -> vector<16x64xf32>
    %c0_4 = arith.constant 0 : index
    %c0_5 = arith.constant 0 : index
    %4 = vector.load %arg5[%c0_4, %c0_5] : memref<1x64xf32, #tpu.memory_space<vmem>>, vector<1x64xf32>
    %5 = vector.broadcast %4 : vector<1x64xf32> to vector<16x64xf32>
    %6 = arith.addf %3, %5 : vector<16x64xf32>
    %c0_6 = arith.constant 0 : index
    %c0_7 = arith.constant 0 : index
    %c0_8 = arith.constant 0 : index
    %7 = vector.load %arg3[%c0_6, %c0_7, %c0_8] : memref<1x16x32xbf16, #tpu.memory_space<vmem>>, vector<1x16x32xbf16>
    %8 = vector.shape_cast %7 : vector<1x16x32xbf16> to vector<16x32xbf16>
    %c0_9 = arith.constant 0 : index
    %c0_10 = arith.constant 0 : index
    %9 = vector.load %arg6[%c0_9, %c0_10] : memref<32x32xbf16, #tpu.memory_space<vmem>>, vector<32x32xbf16>
    %cst_11 = arith.constant dense<0.000000e+00> : vector<16x32xf32>
    %10 = tpu.matmul %8, %9, %cst_11 {dimension_numbers = #tpu.dot_dimension_numbers<[1], [0], [0], [1], [0, 0, 1, 1], [], []>} : vector<16x32xbf16>, vector<32x32xbf16>, vector<16x32xf32> -> vector<16x32xf32>
    %c0_12 = arith.constant 0 : index
    %c0_13 = arith.constant 0 : index
    %11 = vector.load %arg7[%c0_12, %c0_13] : memref<1x32xf32, #tpu.memory_space<vmem>>, vector<1x32xf32>
    %12 = vector.broadcast %11 : vector<1x32xf32> to vector<16x32xf32>
    %13 = arith.addf %10, %12 : vector<16x32xf32>
    %14 = vector.extract_strided_slice %6 {offsets = [0, 0], sizes = [16, 32], strides = [1, 1]} : vector<16x64xf32> to vector<16x32xf32>
    %15 = arith.truncf %14 : vector<16x32xf32> to vector<16x32xbf16>
    %c0_14 = arith.constant 0 : index
    %c0_15 = arith.constant 0 : index
    %c0_16 = arith.constant 0 : index
    %16 = vector.load %arg8[%c0_14, %c0_15, %c0_16] : memref<1x16x32xbf16, #tpu.memory_space<vmem>>, vector<1x16x32xbf16>
    %17 = vector.shape_cast %16 : vector<1x16x32xbf16> to vector<16x32xbf16>
    %18 = vector.shape_cast %15 : vector<16x32xbf16> to vector<1x16x32xbf16>
    tpu.vector_store %arg8[%c0_14, %c0_15, %c0_16], %18 {strides = array<i32>} : memref<1x16x32xbf16, #tpu.memory_space<vmem>>, vector<1x16x32xbf16>,
    %19 = vector.extract_strided_slice %6 {offsets = [0, 32], sizes = [16, 32], strides = [1, 1]} : vector<16x64xf32> to vector<16x32xf32>
    %20 = arith.truncf %19 : vector<16x32xf32> to vector<16x32xbf16>
    %c0_17 = arith.constant 0 : index
    %c0_18 = arith.constant 0 : index
    %c0_19 = arith.constant 0 : index
    %21 = vector.load %arg9[%c0_17, %c0_18, %c0_19] : memref<1x16x32xbf16, #tpu.memory_space<vmem>>, vector<1x16x32xbf16>
    %22 = vector.shape_cast %21 : vector<1x16x32xbf16> to vector<16x32xbf16>
    %23 = vector.shape_cast %20 : vector<16x32xbf16> to vector<1x16x32xbf16>
    tpu.vector_store %arg9[%c0_17, %c0_18, %c0_19], %23 {strides = array<i32>} : memref<1x16x32xbf16, #tpu.memory_space<vmem>>, vector<1x16x32xbf16>,
    %24 = arith.truncf %13 : vector<16x32xf32> to vector<16x32xbf16>
    %c0_20 = arith.constant 0 : index
    %c0_21 = arith.constant 0 : index
    %c0_22 = arith.constant 0 : index
    %25 = vector.load %arg10[%c0_20, %c0_21, %c0_22] : memref<1x16x32xbf16, #tpu.memory_space<vmem>>, vector<1x16x32xbf16>
    %26 = vector.shape_cast %25 : vector<1x16x32xbf16> to vector<16x32xbf16>
    %27 = vector.shape_cast %24 : vector<16x32xbf16> to vector<1x16x32xbf16>
    tpu.vector_store %arg10[%c0_20, %c0_21, %c0_22], %27 {strides = array<i32>} : memref<1x16x32xbf16, #tpu.memory_space<vmem>>, vector<1x16x32xbf16>,
    return
  }
  func.func @transform_0(%arg0: i32, %arg1: i32) -> (i32, i32, i32) {
    %c0_i32 = arith.constant 0 : i32
    %c0_i32_0 = arith.constant 0 : i32
    return %arg0, %arg1, %c0_i32 : i32, i32, i32
  }
  func.func @transform_1(%arg0: i32, %arg1: i32) -> (i32, i32, i32) {
    %c0_i32 = arith.constant 0 : i32
    %c0_i32_0 = arith.constant 0 : i32
    return %arg0, %arg1, %c0_i32 : i32, i32, i32
  }
  func.func @transform_2(%arg0: i32, %arg1: i32) -> (i32, i32) {
    %c0_i32 = arith.constant 0 : i32
    %c0_i32_0 = arith.constant 0 : i32
    %c0_i32_1 = arith.constant 0 : i32
    return %c0_i32, %c0_i32_0 : i32, i32
  }
  func.func @transform_3(%arg0: i32, %arg1: i32) -> (i32, i32) {
    %c0_i32 = arith.constant 0 : i32
    %c0_i32_0 = arith.constant 0 : i32
    %c0_i32_1 = arith.constant 0 : i32
    return %c0_i32, %c0_i32_0 : i32, i32
  }
  func.func @transform_4(%arg0: i32, %arg1: i32) -> (i32, i32) {
    %c0_i32 = arith.constant 0 : i32
    %c0_i32_0 = arith.constant 0 : i32
    %c0_i32_1 = arith.constant 0 : i32
    return %c0_i32, %c0_i32_0 : i32, i32
  }
  func.func @transform_5(%arg0: i32, %arg1: i32) -> (i32, i32) {
    %c0_i32 = arith.constant 0 : i32
    %c0_i32_0 = arith.constant 0 : i32
    %c0_i32_1 = arith.constant 0 : i32
    return %c0_i32, %c0_i32_0 : i32, i32
  }
  func.func @transform_6(%arg0: i32, %arg1: i32) -> (i32, i32, i32) {
    %c0_i32 = arith.constant 0 : i32
    %c0_i32_0 = arith.constant 0 : i32
    return %arg0, %arg1, %c0_i32 : i32, i32, i32
  }
  func.func @transform_7(%arg0: i32, %arg1: i32) -> (i32, i32, i32) {
    %c0_i32 = arith.constant 0 : i32
    %c0_i32_0 = arith.constant 0 : i32
    return %arg0, %arg1, %c0_i32 : i32, i32, i32
  }
  func.func @transform_8(%arg0: i32, %arg1: i32) -> (i32, i32, i32) {
    %c0_i32 = arith.constant 0 : i32
    %c0_i32_0 = arith.constant 0 : i32
    return %arg0, %arg1, %c0_i32 : i32, i32, i32
  }
}

</mosaic_0001>

<bundles_post_ra>
// kernel: tpu_custom_call.1
= control target key start
LH: loop header
LB: loop body
LE: loop exit
PB: predicated region body
PF: predicated region fallthrough
CT: control target
= control target key end

     0   :  { %s1873_s0 = inlined_call_operand.hbm [shape: bf16[2,32,32], index: 0, kind: input, shape index: {}]   ;;  %s1874_s1 = inlined_call_operand.hbm [shape: bf16[2,32,32], index: 1, kind: input, shape index: {}]   ;;  %s1875_s2 = inlined_call_operand.hbm [shape: bf16[32,64], index: 2, kind: input, shape index: {}]   ;;  %s1876_s3 = inlined_call_operand.vmem [shape: f32[1,64], index: 3, kind: input, shape index: {}]   ;;  %s1877_s4 = inlined_call_operand.hbm [shape: bf16[32,32], index: 4, kind: input, shape index: {}]   ;;  %s1878_s5 = inlined_call_operand.vmem [shape: f32[1,32], index: 5, kind: input, shape index: {}]   ;;  %s1879_s6 = inlined_call_operand.hbm [shape: bf16[2,32,32], index: 6, kind: output, shape index: {0}]   ;;  %s1880_s7 = inlined_call_operand.hbm [shape: bf16[2,32,32], index: 7, kind: output, shape index: {1}]   ;;  %s1881_s8 = inlined_call_operand.hbm [shape: bf16[2,32,32], index: 8, kind: output, shape index: {2}]  }
   0x1   :  { %1900 = sst [smem:[#allocation24_spill]] %s1875_s2 }
   0x2   :  { %1901 = sst [smem:[#allocation25_spill]] %s1877_s4 }
   0x3   :  { %1902 = sst [smem:[#allocation26_spill]] %s1878_s5 }
   0x4   :  { %1903 = sst [smem:[#allocation27_spill]] %s1879_s6 }
   0x5   :  { %1904 = sst [smem:[#allocation28_spill]] %s1880_s7 }
   0x6   :  { %1905 = sst [smem:[#allocation29_spill]] %s1881_s8 }
   0x7   :  { %14 = vsyncpa [#allocation3], 0 }
   0x8   :  { %16 = vsyncpa [#allocation3 + $0x1], 0 }
   0x9   :  { %17 = vsyncpa [#allocation6], 0 }
   0xa   :  { %19 = vsyncpa [#allocation6 + $0x1], 0 }
   0xb   :  { %20 = vsyncpa [#allocation9], 0 }
   0xc   :  { %21 = vsyncpa [#allocation4], 0 }
   0xd   :  { %23 = vsyncpa [#allocation4 + $0x1], 0 }
   0xe   :  { %24 = vsyncpa [#allocation12], 0 }
   0xf   :  { %26 = vsyncpa [#allocation12 + $0x1], 0  ;;  %s1435_s27 = smov 0   ;;  %s1437_s28 = smov 0  }
  0x10   :  { %s1439_s29 = smov 0   ;;  %s1441_s30 = smov 0  }
  0x11   :  { %s1443_s9 = smov 0   ;;  %s1445_s10 = smov 0  }
  0x12   :  { %s1447_s11 = smov 0   ;;  %s1449_s12 = smov 0  }
  0x13 LB: > { %1906 = sst [smem:[#allocation20_spill]] %s1346_s27  ;;  %s1476_s13 = sadd.s32 4294967295, %s1374_s12   ;;  %s1374_s12 = sphi %s1449_s12, %s32_s12   ;;  %s1370_s11 = sphi %s1447_s11, %s1946_s11   ;;  %s1366_s10 = sphi %s1445_s10, %s1945_s10   ;;  %s1362_s9 = sphi %s1443_s9, %s1944_s9   ;;  %s1358_s30 = sphi %s1441_s30, %s1943_s30   ;;  %s1354_s29 = sphi %s1439_s29, %s1942_s29   ;;  %s1350_s28 = sphi %s1437_s28, %s1941_s28   ;;  %s1346_s27 = sphi %s1435_s27, %s1940_s27  }
  0x14   : > { %s1882_s14 = sadd.s32 4294967294, %s1374_s12   ;;  %p66_p0 = scmp.ne.s32.totalorder %s1350_s28, %s1346_s27 }
  0x15   : > { %p1884_p1 = scmp.eq.s32.totalorder %s1476_s13, 0  ;;  %p210_p3 = scmp.eq.s32.totalorder %s1882_s14, 3 }
  0x16   : > { %p887_p5 = scmp.ge.s32.totalorder %s1374_s12, 1  ;;  %p273_p7 = scmp.lt.s32.totalorder %s1374_s12, 5 }
  0x17   : > { %p1487_p4 = por %p1884_p1, %p66_p0  ;;  %p1492_p6 = por %p210_p3, %p66_p0 }
  0x18   : > { %p1497_p8 = pnand %p887_p5, %p273_p7  ;;  %s1376_s18 = smov [#allocation7]  }
  0x19   : > { %s1907_s15 = scalar_select %p1487_p4, 1, 0 }
  0x1a   : > { %s1908_s16 = scalar_select %p1492_p6, 1, 0 }
  0x1b   : > { %s1910_s17 = scalar_select %p1497_p8, 1, 0 }
  0x1c   : > { %1909 = sst [smem:[#allocation21_spill]] %s1908_s16  ;;  %s285_s19 = sshll.u32 %s1376_s18, 4  ;;  %s286_s19 = int_to_ptr.vmem [resolvable:$true] %s285_s19 }
  0x1d   : > { %p979_p9 = pneg %p1497_p8  ;;  %s1377_s21 = smov [#allocation8]  }
  0x1e   : > { %s301_s22 = sshll.u32 %s1377_s21, 4  ;;  %s1912_s2 = sld [smem:[#allocation24_spill]]  ;;  %s1509_s22 = int_to_ptr.vmem [resolvable:$true] %s301_s22 }
  0x1f   : > { %p1505_p10 = pnand %p979_p9, %p1884_p1 }
  0x21   : > { %p1090_p12 = pneg %p1505_p10 }
  0x24   : > { %s1088_s25 = scalar_lea.hbm %s1912_s2, 256 }
  0x25   : > { %p1089_p11 = scmp.ne.s32.totalorder %s1912_s2, %s1088_s25  ;;  %p1095_p3 = scmp.lt.u32.totalorder %s1088_s25, %s1912_s2 }
  0x27   : > { %p1091_p13 = pnand %p1090_p12, %p1089_p11 }
  0x29   : > { %p1092_p0 = pneg %p1091_p13 }
  0x2b   : > { %p1097_p5 = pnand %p1095_p3, %p1092_p0 }
  0x2d   : > { %1100 = shalt.err (!%p1097_p5)
}
  0x2e   : > { %s1101_s21 = scalar_lea.vmem %s286_s19, 256  ;;  %p1109_p2 = scmp.lt.s32.totalorder %s286_s19, %s286_s19 }
  0x2f   : > { %p1102_p7 = scmp.ne.s32.totalorder %s286_s19, %s1101_s21  ;;  %p1110_p6 = scmp.lt.s32.totalorder %s1101_s21, %s1101_s21 }
  0x31   : > { %p1104_p9 = pnand %p1102_p7, %p1090_p12  ;;  %p1111_p4 = por %p1110_p6, %p1109_p2 }
  0x33   : > { %p1105_p1 = pneg %p1104_p9 }
  0x35   : > { %p1112_p8 = pnand %p1111_p4, %p1105_p1 }
  0x37   : > { %1115 = shalt.err (!%p1112_p8)
}
  0x38   : > { %s1890_s23 = smov 64   ;;  %s1892_s24 = smov 4  }
  0x39   : > { %982 = dma.hbm_to_vmem [thread:$0]  (!%p1505_p10), %s1912_s2, 256, %s286_s19, [#allocation6], %s1890_s23, %s1890_s23, %s1892_s24  }
  0x3a   : > { %s1913_s4 = sld [smem:[#allocation25_spill]] }
  0x40   : > { %s1116_s18 = scalar_lea.hbm %s1913_s4, 256 }
  0x41   : > { %p1117_p1 = scmp.ne.s32.totalorder %s1913_s4, %s1116_s18  ;;  %p1123_p6 = scmp.lt.u32.totalorder %s1116_s18, %s1913_s4 }
  0x43   : > { %p1119_p2 = pnand %p1117_p1, %p1090_p12 }
  0x45   : > { %p1120_p4 = pneg %p1119_p2 }
  0x47   : > { %p1125_p8 = pnand %p1123_p6, %p1120_p4 }
  0x49   : > { %1128 = shalt.err (!%p1125_p8)
}
  0x4a   : > { %s1129_s19 = scalar_lea.vmem %s1509_s22, 256  ;;  %p1137_p3 = scmp.lt.s32.totalorder %s1509_s22, %s1509_s22 }
  0x4b   : > { %p1130_p11 = scmp.ne.s32.totalorder %s1509_s22, %s1129_s19  ;;  %p1138_p5 = scmp.lt.s32.totalorder %s1129_s19, %s1129_s19 }
  0x4d   : > { %p1132_p13 = pnand %p1130_p11, %p1090_p12  ;;  %p1139_p7 = por %p1138_p5, %p1137_p3 }
  0x4f   : > { %p1133_p0 = pneg %p1132_p13 }
  0x51   : > { %p1140_p9 = pnand %p1139_p7, %p1133_p0 }
  0x53   : > { %1143 = shalt.err (!%p1140_p9)
}
  0x54   : > { %985 = dma.hbm_to_vmem [thread:$0]  (!%p1505_p10), %s1913_s4, 256, %s1509_s22, [#allocation9], %s1890_s23, %s1890_s23, %s1892_s24  }
  0x55   : > { %s41_s27 = sadd.s32 1, %s1366_s10  ;;  %s44_s20 = sadd.s32 1, %s1370_s11 }
  0x56   : > { %p42_p12 = scmp.ge.s32.totalorder %s41_s27, 2  ;;  %s53_s14 = sadd.s32 1, %s1354_s29 }
  0x57   : > { %p60_p1 = scmp.ne.s32.totalorder %s1354_s29, %s1350_s28  ;;  %p61_p2 = scmp.eq.s32.totalorder %s1374_s12, 0 }
  0x58   : > { %s1948_s27 = smov (%p42_p12, %s41_s27), 0  ;;  %s1950_s20 = smov (!%p42_p12, %s44_s20), %s1370_s11 }
  0x59   : > { %1914 = sst [smem:[#allocation22_spill]] %s1948_s27  ;;  %s49_s16 = ssub.s32 %s1366_s10, %s1948_s27 }
  0x5a   : > { %p1575_p4 = por %p61_p2, %p60_p1  ;;  %p46_p10 = scmp.ge.s32.totalorder %s1950_s20, 2 }
  0x5b   : > { %p1916_p6 = scmp.eq.s32.totalorder %s1476_s13, 3  ;;  %p1005_p11 = scmp.lt.s32.totalorder %s1374_s12, 4 }
  0x5c   : > { %s318_s26 = sand.u32 1, %s1354_s29   ;;  %s1952_s20 = smov (%p46_p10, %s1950_s20), 0 }
  0x5d   : > { %p1581_p8 = por %p1916_p6, %p60_p1  ;;  %s891_s18 = sshll.u32 %s318_s26, 3 }
  0x5e   : > { %s48_s21 = ssub.s32 %s1370_s11, %s1952_s20  ;;  %s892_s7 = sshll.u32 %s1366_s10, 1 }
  0x5f   : > { %s1917_s22 = scalar_select %p1581_p8, 1, 0 }
  0x60   : > { %s50_s19 = sor.u32 %s49_s16, %s48_s21  ;;  %s893_s8 = sshll.u32 %s1370_s11, 2 }
  0x61   : > { %1918 = sst [smem:[#allocation23_spill]] %s1917_s22  ;;  %p51_p13 = scmp.eq.s32.totalorder %s50_s19, 0 }
  0x62   : > { %s328_s23 = sadd.s32 %s893_s8, %s892_s7  ;;  %s322_s24 = scalar_lea.vmem [#allocation2], %s891_s18 }
  0x63   : > { %s331_s2 = sshll.u32 %s322_s24, 4  ;;  %s894_s27 = sshll.u32 %s328_s23, 6  ;;  %s1596_s2 = int_to_ptr.vmem [resolvable:$true] %s331_s2 }
  0x64   : > { %s1594_s4 = scalar_select %p51_p13, %s1354_s29, %s53_s14  }
  0x65   : > { %s1601_s5 = scalar_lea.hbm %s1873_s0, %s894_s27  ;;  %p1607_p0 = pnand %p1005_p11, %p1575_p4 }
  0x66   : > { %s1614_s23 = scalar_lea.hbm %s1874_s1, %s894_s27  ;;  %s345_s6 = scalar_lea.vmem [#allocation5], %s891_s18 }
  0x67   : > { %s1616_s22 = sshll.u32 %s345_s6, 4  ;;  %s1618_s25 = scalar_lea.sflag [#allocation3], %s318_s26  ;;  %s1650_s22 = int_to_ptr.vmem [resolvable:$true] %s1616_s22 }
  0x68   : > { %s1144_s21 = scalar_lea.hbm %s1601_s5, 128  ;;  %p1146_p5 = pneg %p1607_p0 }
  0x69   : > { %p1145_p3 = scmp.ne.s32.totalorder %s1601_s5, %s1144_s21  ;;  %s1149_s8 = scalar_lea.hbm %s1873_s0, 512 }
  0x6a   : > { %p1150_p12 = scmp.lt.u32.totalorder %s1601_s5, %s1873_s0  ;;  %p1151_p1 = scmp.lt.u32.totalorder %s1149_s8, %s1144_s21 }
  0x6b   : > { %p1147_p7 = pnand %p1146_p5, %p1145_p3  ;;  %p1153_p4 = scmp.lt.u32.totalorder %s1144_s21, %s1601_s5 }
  0x6c   : > { %p1152_p2 = por %p1151_p1, %p1150_p12 }
  0x6d   : > { %p1148_p9 = pneg %p1147_p7 }
  0x6e   : > { %p1154_p10 = por %p1153_p4, %p1152_p2 }
  0x70   : > { %p1155_p6 = pnand %p1154_p10, %p1148_p9 }
  0x72   : > { %1158 = shalt.err (!%p1155_p6)
}
  0x73   : > { %s1159_s26 = scalar_lea.vmem %s1596_s2, 128  ;;  %s1380_s18 = smov [#allocation2]  }
  0x74   : > { %p1160_p11 = scmp.ne.s32.totalorder %s1596_s2, %s1159_s26  ;;  %s1164_s14 = sshll.u32 %s1380_s18, 4  ;;  %s1165_s14 = int_to_ptr.vmem [resolvable:$false] %s1164_s14 }
  0x75   : > { %s1166_s6 = scalar_lea.vmem %s1165_s14, 256  ;;  %p1167_p7 = scmp.lt.s32.totalorder %s1596_s2, %s1165_s14 }
  0x76   : > { %p1162_p13 = pnand %p1160_p11, %p1146_p5  ;;  %p1168_p12 = scmp.lt.s32.totalorder %s1166_s6, %s1159_s26 }
  0x78   : > { %p1163_p3 = pneg %p1162_p13  ;;  %p1169_p1 = por %p1168_p12, %p1167_p7 }
  0x7a   : > { %p1170_p2 = pnand %p1169_p1, %p1163_p3 }
  0x7c   : > { %1173 = shalt.err (!%p1170_p2)
}
  0x7d   : > { %s1920_s21 = smov 4   ;;  %s1921_s19 = smov 64  }
  0x7e   : > { %989 = dma.hbm_to_vmem [thread:$0]  (!%p1607_p0), %s1601_s5, 128, %s1596_s2, %s1618_s25, %s1921_s19, %s1921_s19, %s1920_s21  }
  0x7f   : > { %s341_s7 = sand.u32 1, %s1374_s12   ;;  %s1174_s24 = scalar_lea.hbm %s1614_s23, 128 }
  0x80   : > { %s1653_s8 = scalar_lea.sflag [#allocation6], %s341_s7  ;;  %p1175_p9 = scmp.ne.s32.totalorder %s1614_s23, %s1174_s24 }
  0x81   : > { %s1179_s18 = scalar_lea.hbm %s1874_s1, 512  ;;  %p1180_p6 = scmp.lt.u32.totalorder %s1614_s23, %s1874_s1 }
  0x82   : > { %p1177_p4 = pnand %p1175_p9, %p1146_p5  ;;  %p1181_p11 = scmp.lt.u32.totalorder %s1179_s18, %s1174_s24 }
  0x83   : > { %p1183_p3 = scmp.lt.u32.totalorder %s1174_s24, %s1614_s23 }
  0x84   : > { %p1178_p10 = pneg %p1177_p4  ;;  %p1182_p13 = por %p1181_p11, %p1180_p6 }
  0x86   : > { %p1184_p7 = por %p1183_p3, %p1182_p13 }
  0x88   : > { %p1185_p12 = pnand %p1184_p7, %p1178_p10 }
  0x8a   : > { %1188 = shalt.err (!%p1185_p12)
}
  0x8b   : > { %s1189_s2 = scalar_lea.vmem %s1650_s22, 128  ;;  %s1381_s5 = smov [#allocation5]  }
  0x8c   : > { %p1190_p1 = scmp.ne.s32.totalorder %s1650_s22, %s1189_s2  ;;  %s1194_s25 = sshll.u32 %s1381_s5, 4  ;;  %s1195_s25 = int_to_ptr.vmem [resolvable:$false] %s1194_s25 }
  0x8d   : > { %s1196_s7 = scalar_lea.vmem %s1195_s25, 256  ;;  %p1197_p4 = scmp.lt.s32.totalorder %s1650_s22, %s1195_s25 }
  0x8e   : > { %p1192_p2 = pnand %p1190_p1, %p1146_p5  ;;  %p1198_p6 = scmp.lt.s32.totalorder %s1196_s7, %s1189_s2 }
  0x90   : > { %p1193_p9 = pneg %p1192_p2  ;;  %p1199_p11 = por %p1198_p6, %p1197_p4 }
  0x92   : > { %p1200_p13 = pnand %p1199_p11, %p1193_p9 }
  0x94   : > { %1203 = shalt.err (!%p1200_p13)
}
  0x95   : > { %992 = dma.hbm_to_vmem [thread:$0]  (!%p1607_p0), %s1614_s23, 128, %s1650_s22, %s1653_s8, %s1921_s19, %s1921_s19, %s1920_s21  }
  0x96   : > { %p1922_p5 = scmp.ne.s32.totalorder %s1910_s17, 0 }
  0x97   : > { %s1685_s24 = sand.u32 (!%p1922_p5), 1, %s1350_s28   ;;  %p1923_p10 = scmp.ne.s32.totalorder (!%p1922_p5), %s1907_s15, 0 }
  0x98   : > { %366 = sbr.rel (%p1922_p5) target bundleno = 562 (0x232), region = 44  ;;  %s1688_s27 = sshll.u32 (!%p1922_p5), %s1685_s24, 3 }
  0x99   : > { %s369_s16 = scalar_lea.sflag (!%p1922_p5), [#allocation3], %s1685_s24  ;;  %s372_s26 = scalar_lea.vmem (!%p1922_p5), [#allocation2], %s1688_s27 }
  0x9f   : > { %1321 = dma.done.wait (%p1923_p10), %s369_s16, 128  }
  0xa0   : > { %1323 = vsyncadd (%p1923_p10), %s369_s16, 4294967168  ;;  %s377_s17 = sand.u32 1, %s1476_s13   ;;  %s381_s22 = scalar_lea.vmem [#allocation5], %s1688_s27 }
  0xa1   : > { %s378_s23 = scalar_lea.sflag [#allocation6], %s377_s17 }
  0xa2   : > { %1325 = dma.done.wait (%p1923_p10), %s378_s23, 128  }
  0xa3   : > { %1327 = vsyncadd (%p1923_p10), %s378_s23, 4294967168  ;;  %p1924_p0 = scmp.eq.s32.totalorder %s1476_s13, 0 }
  0xa5   : > { %1329 = dma.done.wait (%p1924_p0), [#allocation6], 256   ;;  %p1925_p3 = pmov %p1924_p0 }
  0xa6   : > { %p1926_p7 = pmov %p1924_p0 }
  0xa7   : > { %1331 = vsyncadd (%p1925_p3), [#allocation6], 4294967040 }
  0xa8   : > { %1333 = dma.done.wait (%p1926_p7), [#allocation9], 256   ;;  %p1927_p12 = pmov %p1924_p0 }
  0xa9   : > { %v1382_v0 = vmov 0.0   ;;  %vm1383_vm0 = vmmov 0   ;;  %v1082_v1 = vld [vmem:[#allocation7] sm:$0xff]   ;;  %v1083_v2 = vld [vmem:[#allocation7 + $0x8] sm:$0xff]   ;;  %v1085_v3 = vld [vmem:[#allocation8] sm:$0xff]   ;;  %vm473_vm1 = vcmask 261120  }
  0xaa   : > { %1335 = vsyncadd (%p1927_p12), [#allocation9], 4294967040  ;;  %945 = vmatprep.subr.bf16.mxu0 %v1382_v0  ;;  %949 = vmatprep.mubr.msk.bf16.mxu0 %vm1383_vm0, %v1382_v0  ;;  %v1084_v4 = vld [vmem:[%s372_s26] sm:$0xff]   ;;  %v1086_v5 = vld [vmem:[#allocation8 + $0x8] sm:$0xff]   ;;  %s924_s15 = sshll.u32 %s1358_s30, 1  ;;  %s925_s21 = sshll.u32 %s1362_s9, 2 }
  0xab   : > { %953 = vmatprep.subr.bf16.mxu1 %v1382_v0  ;;  %957 = vmatprep.mubr.msk.bf16.mxu1 %vm1383_vm0, %v1382_v0  ;;  %v1087_v6 = vld [vmem:[%s381_s22] sm:$0xff]   ;;  %v907_v7 = vld [vmem:[%s1876_s3] ss:$0 sm:$0xff]  ;;  %s644_s18 = sadd.s32 %s925_s21, %s924_s15  ;;  %s1928_s2 = sld [smem:[#allocation26_spill]]  ;;  %vm600_vm2 = vcmask 257024  }
  0xac   : > { %946 = vmatpush3.bf16.msra.mxu0 %v1082_v1  ;;  %954 = vmatpush3.bf16.msra.mxu1 %v1085_v3  ;;  %s422_s5 = scalar_lea.vmem [#allocation10], %s1688_s27  ;;  %s1721_s7 = sshll.u32 %s644_s18, 6 }
  0xad   : > { %947 = vmatprep.subr.bf16.mxu0 %v1382_v0  ;;  %955 = vmatprep.subr.bf16.mxu1 %v1382_v0  ;;  %s647_s25 = sshll.u32 %s422_s5, 4  ;;  %s1384_s9 = smov 96   ;;  %s1731_s25 = int_to_ptr.vmem [resolvable:$true] %s647_s25 }
  0xae   : > { %s1930_s23 = sld [smem:[#allocation27_spill]]  ;;  %s1735_s15 = scalar_lea.vmem [#allocation13], %s1688_s27 }
  0xaf   : > { %s622_s21 = scalar_lea.sflag [#allocation4], %s1685_s24  ;;  %s1204_s19 = scalar_lea.vmem %s1731_s25, 128 }
  0xb0   : > { %948 = vmatpush3.bf16.msra.mxu0 %v1083_v2  ;;  %956 = vmatpush3.bf16.msra.mxu1 %v1086_v5  ;;  %p1205_p1 = scmp.ne.s32.totalorder %s1731_s25, %s1204_s19  ;;  %s1385_s8 = smov [#allocation10]  }
  0xb1   : > { %v912_v11 = vld [vmem:[%s1928_s2] ss:$0 sm:$0xff]  ;;  %s1208_s18 = sshll.u32 %s1385_s8, 4  ;;  %s1209_s18 = int_to_ptr.vmem [resolvable:$false] %s1208_s18 }
  0xb2   : > { %p1206_p2 = pnand %p1205_p1, %p1581_p8  ;;  %s1210_s14 = scalar_lea.vmem %s1209_s18, 256 }
  0xb3   : > { %950 = vmatmul.mubr.msk.bf16.vlgmr.msra.gmra.mrb[0].mxu0 %vm473_vm1, %v1084_v4  ;;  %958 = vmatmul.mubr.msk.bf16.vlgmr.msra.gmra.mrb[0].mxu1 %vm473_vm1, %v1087_v6  ;;  %p1211_p4 = scmp.lt.s32.totalorder %s1731_s25, %s1209_s18  ;;  %p1212_p6 = scmp.lt.s32.totalorder %s1210_s14, %s1204_s19 }
  0xb4   : > { %s1729_s22 = scalar_lea.hbm %s1930_s23, %s1721_s7  ;;  %p1207_p9 = pneg %p1206_p2 }
  0xb5   : > { %p1213_p11 = por %p1212_p6, %p1211_p4 }
  0xb7   : > { %p1214_p13 = pnand %p1213_p11, %p1207_p9 }
 0x186   : > { %v511_v8 = vpop.f32.mrb[0].mxu0  ;;  %v585_v16 = vpop.f32.mrb[0].mxu1 }
 0x187   : > { %v512_v9 = vadd.f32 %v907_v7, %v511_v8  ;;  %v951_v10 = vpop.f32.mrb[1].mxu0  ;;  %v586_v17 = vadd.f32 %v912_v11, %v585_v16  ;;  %v959_v18 = vpop.f32.mrb[1].mxu1 }
 0x188   : > { %v514_v12 = vpop.f32.mrb[2].mxu0  ;;  %v588_v20 = vpop.f32.mrb[2].mxu1 }
 0x189   : > { %v935_v13 = vpack.c.bf16 %v512_v9, %v512_v9  ;;  %v515_v14 = vadd.f32 %v907_v7, %v514_v12  ;;  %v952_v15 = vpop.f32.mrb[3].mxu0  ;;  %v937_v21 = vpack.c.bf16 %v586_v17, %v586_v17  ;;  %v589_v22 = vadd.f32 %v912_v11, %v588_v20  ;;  %v960_v23 = vpop.f32.mrb[3].mxu1 }
 0x18b   : > { %601 = vst.msk [vmem:[%s422_s5] sm:$0xf] %vm600_vm2, %v935_v13  ;;  %v936_v19 = vpack.c.bf16 %v515_v14, %v515_v14  ;;  %603 = vrot.lane.b32.xlu0 %v935_v13, %s1384_s9  ;;  %619 = vst.msk [vmem:[%s1735_s15] sm:$0xf] %vm600_vm2, %v937_v21  ;;  %v938_v24 = vpack.c.bf16 %v589_v22, %v589_v22 }
 0x18d   : > { %602 = vst.msk [vmem:[%s422_s5 + $0x4] sm:$0xf] %vm600_vm2, %v936_v19 }
 0x18e   : > { %1217 = shalt.err (!%p1214_p13)
}
 0x18f   : > { %s1218_s6 = scalar_lea.hbm %s1729_s22, 128  ;;  %s1222_s16 = scalar_lea.hbm %s1930_s23, 512 }
 0x190   : > { %p1219_p5 = scmp.ne.s32.totalorder %s1729_s22, %s1218_s6  ;;  %p1223_p3 = scmp.lt.u32.totalorder %s1729_s22, %s1930_s23 }
 0x191   : > { %p1224_p7 = scmp.lt.u32.totalorder %s1222_s16, %s1218_s6  ;;  %p1226_p1 = scmp.lt.u32.totalorder %s1218_s6, %s1729_s22 }
 0x192   : > { %p1220_p10 = pnand %p1219_p5, %p1581_p8 }
 0x193   : > { %p1225_p12 = por %p1224_p7, %p1223_p3 }
 0x194   : > { %p1221_p0 = pneg %p1220_p10 }
 0x195   : > { %p1227_p2 = por %p1226_p1, %p1225_p12 }
 0x197   : > { %p1228_p9 = pnand %p1227_p2, %p1221_p0 }
 0x199   : > { %1231 = shalt.err (!%p1228_p9)
}
 0x19a   : > { %s1898_s19 = smov 64   ;;  %s1387_s18 = smov 4   ;;  %605 = vrot.lane.b32.xlu0 %v936_v19, %s1384_s9  ;;  %620 = vst.msk [vmem:[%s1735_s15 + $0x4] sm:$0xf] %vm600_vm2, %v938_v24 }
 0x19b   : > { %973 = dma.vmem_to_hbm [thread:$0]  (%p1581_p8), %s1731_s25, 128, %s1729_s22, %s622_s21, %s1898_s19, %s1898_s19, %s1387_s18  }
 0x19c   : > { %s429_s14 = scalar_lea.vmem [#allocation11], %s1688_s27  ;;  %s683_s2 = sshll.u32 %s1735_s15, 4  ;;  %s1780_s2 = int_to_ptr.vmem [resolvable:$true] %s683_s2 }
 0x19d   : > { %s665_s6 = sshll.u32 %s429_s14, 4  ;;  %s1931_s26 = sld [smem:[#allocation28_spill]]  ;;  %s1772_s6 = int_to_ptr.vmem [resolvable:$true] %s665_s6 }
 0x19e   : > { %s1932_s9 = sld [smem:[#allocation29_spill]]  ;;  %s1791_s15 = scalar_lea.sflag [#allocation12], %s377_s17 }
 0x19f   : > { %s1232_s8 = scalar_lea.vmem %s1772_s6, 128  ;;  %s1388_s5 = smov [#allocation11]  }
 0x1a0   : > { %p1233_p4 = scmp.ne.s32.totalorder %s1772_s6, %s1232_s8  ;;  %s1236_s16 = sshll.u32 %s1388_s5, 4  ;;  %s1237_s16 = int_to_ptr.vmem [resolvable:$false] %s1236_s16 }
 0x1a1   : > { %s1238_s19 = scalar_lea.vmem %s1237_s16, 256  ;;  %p1239_p13 = scmp.lt.s32.totalorder %s1772_s6, %s1237_s16 }
 0x1a2   : > { %p1234_p6 = pnand %p1233_p4, %p1581_p8  ;;  %p1240_p5 = scmp.lt.s32.totalorder %s1238_s19, %s1232_s8 }
 0x1a3   : > { %s1778_s24 = scalar_lea.hbm %s1931_s26, %s1721_s7 }
 0x1a4   : > { %s1933_s22 = smov %s1932_s9  ;;  %s1786_s21 = scalar_lea.hbm %s1932_s9, %s1721_s7 }
 0x1a5   : > { %p1235_p11 = pneg %p1234_p6  ;;  %p1241_p10 = por %p1240_p5, %p1239_p13 }
 0x1a7   : > { %p1242_p0 = pnand %p1241_p10, %p1235_p11 }
 0x1fd   : > { %v604_v25 = vpop.permute.xlu0 %603 }
 0x1fe   : > { %609 = vst.msk [vmem:[%s429_s14] sm:$0xf] %vm600_vm2, %v604_v25 }
 0x20c   : > { %v606_v26 = vpop.permute.xlu0 %605 }
 0x20d   : > { %610 = vst.msk [vmem:[%s429_s14 + $0x4] sm:$0xf] %vm600_vm2, %v606_v26 }
 0x20e   : > { %1245 = shalt.err (!%p1242_p0)
}
 0x20f   : > { %s1246_s13 = scalar_lea.hbm %s1778_s24, 128  ;;  %s1250_s14 = scalar_lea.hbm %s1931_s26, 512 }
 0x210   : > { %p1247_p3 = scmp.ne.s32.totalorder %s1778_s24, %s1246_s13  ;;  %p1251_p1 = scmp.lt.u32.totalorder %s1778_s24, %s1931_s26 }
 0x211   : > { %p1252_p2 = scmp.lt.u32.totalorder %s1250_s14, %s1246_s13  ;;  %p1254_p4 = scmp.lt.u32.totalorder %s1246_s13, %s1778_s24 }
 0x212   : > { %p1248_p7 = pnand %p1247_p3, %p1581_p8 }
 0x213   : > { %p1253_p9 = por %p1252_p2, %p1251_p1 }
 0x214   : > { %p1249_p12 = pneg %p1248_p7 }
 0x215   : > { %p1255_p6 = por %p1254_p4, %p1253_p9 }
 0x217   : > { %p1256_p11 = pnand %p1255_p6, %p1249_p12 }
 0x219   : > { %1259 = shalt.err (!%p1256_p11)
}
 0x21a   : > { %s1934_s19 = smov 64   ;;  %s1260_s9 = scalar_lea.vmem %s1780_s2, 128 }
 0x21b   : > { %974 = dma.vmem_to_hbm [thread:$0]  (%p1581_p8), %s1772_s6, 128, %s1778_s24, %s1791_s15, %s1934_s19, %s1934_s19, %s1387_s18  }
 0x21c   : > { %p1261_p13 = scmp.ne.s32.totalorder %s1780_s2, %s1260_s9  ;;  %s1389_s8 = smov [#allocation13]  }
 0x21d   : > { %s1264_s5 = sshll.u32 %s1389_s8, 4  ;;  %s1265_s5 = int_to_ptr.vmem [resolvable:$false] %s1264_s5 }
 0x21e   : > { %p1262_p5 = pnand %p1261_p13, %p1581_p8  ;;  %s1266_s16 = scalar_lea.vmem %s1265_s5, 256 }
 0x21f   : > { %p1267_p0 = scmp.lt.s32.totalorder %s1780_s2, %s1265_s5  ;;  %p1268_p3 = scmp.lt.s32.totalorder %s1266_s16, %s1260_s9 }
 0x220   : > { %p1263_p10 = pneg %p1262_p5 }
 0x221   : > { %p1269_p7 = por %p1268_p3, %p1267_p0 }
 0x223   : > { %p1270_p12 = pnand %p1269_p7, %p1263_p10 }
 0x225   : > { %1273 = shalt.err (!%p1270_p12)
}
 0x226   : > { %s1274_s6 = scalar_lea.hbm %s1786_s21, 128  ;;  %s1278_s17 = scalar_lea.hbm %s1933_s22, 512 }
 0x227   : > { %p1275_p1 = scmp.ne.s32.totalorder %s1786_s21, %s1274_s6  ;;  %p1279_p4 = scmp.lt.u32.totalorder %s1786_s21, %s1933_s22 }
 0x228   : > { %p1280_p6 = scmp.lt.u32.totalorder %s1278_s17, %s1274_s6  ;;  %p1282_p13 = scmp.lt.u32.totalorder %s1274_s6, %s1786_s21 }
 0x229   : > { %p1276_p2 = pnand %p1275_p1, %p1581_p8 }
 0x22a   : > { %p1281_p11 = por %p1280_p6, %p1279_p4 }
 0x22b   : > { %p1277_p9 = pneg %p1276_p2 }
 0x22c   : > { %p1283_p5 = por %p1282_p13, %p1281_p11 }
 0x22e   : > { %p1284_p10 = pnand %p1283_p5, %p1277_p9 }
 0x230   : > { %1287 = shalt.err (!%p1284_p10)
}
 0x231   : > { %975 = dma.vmem_to_hbm [thread:$0]  (%p1581_p8), %s1780_s2, 128, %s1786_s21, %s1791_s15, %s1934_s19, %s1934_s19, %s1387_s18  }
 0x232 PF: > { %s1935_s25 = sld [smem:[#allocation20_spill]]  ;;  %s1936_s27 = sld [smem:[#allocation21_spill]] }
 0x233   : > { %p1008_p0 = scmp.ge.s32.totalorder %s1374_s12, 2 }
 0x238   : > { %s698_s9 = sand.u32 1, %s1935_s25   ;;  %p1937_p3 = scmp.ne.s32.totalorder %s1936_s27, 0 }
 0x239   : > { %s699_s8 = scalar_lea.sflag [#allocation4], %s698_s9 }
 0x23a   : > { %p994_p7 = pnand %p1008_p0, %p1937_p3 }
 0x23c   : > { %1337 = dma.done.wait (!%p994_p7), %s699_s8, 128  }
 0x23d   : > { %1339 = vsyncadd (!%p994_p7), %s699_s8, 4294967168  ;;  %s1938_s30 = sadd.s32 4294967294, %s1374_s12  }
 0x23e   : > { %s707_s5 = sand.u32 1, %s1938_s30  }
 0x23f   : > { %s708_s16 = scalar_lea.sflag [#allocation12], %s707_s5 }
 0x240   : > { %1341 = dma.done.wait (!%p994_p7), %s708_s16, 256  }
 0x241   : > { %1343 = vsyncadd (!%p994_p7), %s708_s16, 4294967040  ;;  %s32_s12 = sadd.s32 1, %s1374_s12   ;;  %s1939_s18 = sld [smem:[#allocation22_spill]] }
 0x242   : > { %p29_p8 = scmp.ge.s32.totalorder %s32_s12, 6   ;;  %s1940_s27 = smov %s1350_s28 }
 0x243   : > { %s1941_s28 = smov %s1354_s29  ;;  %s1942_s29 = smov %s1594_s4 }
 0x244   : > { %s1943_s30 = smov %s1366_s10  ;;  %s1944_s9 = smov %s1370_s11 }
 0x245   : > { %s1946_s11 = smov %s1952_s20  ;;  %31 = sbr.rel (!%p29_p8) target bundleno = 19 (0x13), region = 142 }
 0x247   : > { %s1945_s10 = smov %s1939_s18 }
 0x24c   :  { %722 = vsyncpa [#allocation3], 1 }
 0x24d   :  { %724 = vsyncpa [#allocation3 + $0x1], 1 }
 0x24e   :  { %725 = vsyncpa [#allocation6], 1 }
 0x24f   :  { %727 = vsyncpa [#allocation6 + $0x1], 1 }
 0x250   :  { %728 = vsyncpa [#allocation9], 1 }
 0x251   :  { %729 = vsyncpa [#allocation4], 1 }
 0x252   :  { %731 = vsyncpa [#allocation4 + $0x1], 1 }
 0x253   :  { %732 = vsyncpa [#allocation12], 1 }
 0x254   :  { %734 = vsyncpa [#allocation12 + $0x1], 1 }

// kernel: tpu_custom_call.1
= control target key start
LH: loop header
LB: loop body
LE: loop exit
PB: predicated region body
PF: predicated region fallthrough
CT: control target
= control target key end

     0   :  { %s1873_s0 = inlined_call_operand.hbm [shape: bf16[2,32,32], index: 0, kind: input, shape index: {}]   ;;  %s1874_s1 = inlined_call_operand.hbm [shape: bf16[2,32,32], index: 1, kind: input, shape index: {}]   ;;  %s1875_s2 = inlined_call_operand.hbm [shape: bf16[32,64], index: 2, kind: input, shape index: {}]   ;;  %s1876_s3 = inlined_call_operand.vmem [shape: f32[1,64], index: 3, kind: input, shape index: {}]   ;;  %s1877_s4 = inlined_call_operand.hbm [shape: bf16[32,32], index: 4, kind: input, shape index: {}]   ;;  %s1878_s5 = inlined_call_operand.vmem [shape: f32[1,32], index: 5, kind: input, shape index: {}]   ;;  %s1879_s6 = inlined_call_operand.hbm [shape: bf16[2,32,32], index: 6, kind: output, shape index: {0}]   ;;  %s1880_s7 = inlined_call_operand.hbm [shape: bf16[2,32,32], index: 7, kind: output, shape index: {1}]   ;;  %s1881_s8 = inlined_call_operand.hbm [shape: bf16[2,32,32], index: 8, kind: output, shape index: {2}]  }
   0x1   :  { %1900 = sst [smem:[#allocation24_spill]] %s1875_s2 }
   0x2   :  { %1901 = sst [smem:[#allocation25_spill]] %s1877_s4 }
   0x3   :  { %1902 = sst [smem:[#allocation26_spill]] %s1878_s5 }
   0x4   :  { %1903 = sst [smem:[#allocation27_spill]] %s1879_s6 }
   0x5   :  { %1904 = sst [smem:[#allocation28_spill]] %s1880_s7 }
   0x6   :  { %1905 = sst [smem:[#allocation29_spill]] %s1881_s8 }
   0x7   :  { %14 = vsyncpa [#allocation3], 0 }
   0x8   :  { %16 = vsyncpa [#allocation3 + $0x1], 0 }
   0x9   :  { %17 = vsyncpa [#allocation6], 0 }
   0xa   :  { %19 = vsyncpa [#allocation6 + $0x1], 0 }
   0xb   :  { %20 = vsyncpa [#allocation9], 0 }
   0xc   :  { %21 = vsyncpa [#allocation4], 0 }
   0xd   :  { %23 = vsyncpa [#allocation4 + $0x1], 0 }
   0xe   :  { %24 = vsyncpa [#allocation12], 0 }
   0xf   :  { %26 = vsyncpa [#allocation12 + $0x1], 0  ;;  %s1435_s27 = smov 0   ;;  %s1437_s28 = smov 0  }
  0x10   :  { %s1439_s29 = smov 0   ;;  %s1441_s30 = smov 0  }
  0x11   :  { %s1443_s9 = smov 0   ;;  %s1445_s10 = smov 0  }
  0x12   :  { %s1447_s11 = smov 0   ;;  %s1449_s12 = smov 0  }
  0x13 LB: > { %1906 = sst [smem:[#allocation20_spill]] %s1346_s27  ;;  %s1476_s13 = sadd.s32 4294967295, %s1374_s12   ;;  %s1374_s12 = sphi %s1449_s12, %s32_s12   ;;  %s1370_s11 = sphi %s1447_s11, %s1946_s11   ;;  %s1366_s10 = sphi %s1445_s10, %s1945_s10   ;;  %s1362_s9 = sphi %s1443_s9, %s1944_s9   ;;  %s1358_s30 = sphi %s1441_s30, %s1943_s30   ;;  %s1354_s29 = sphi %s1439_s29, %s1942_s29   ;;  %s1350_s28 = sphi %s1437_s28, %s1941_s28   ;;  %s1346_s27 = sphi %s1435_s27, %s1940_s27  }
  0x14   : > { %s1882_s14 = sadd.s32 4294967294, %s1374_s12   ;;  %p66_p0 = scmp.ne.s32.totalorder %s1350_s28, %s1346_s27 }
  0x15   : > { %p1884_p1 = scmp.eq.s32.totalorder %s1476_s13, 0  ;;  %p210_p3 = scmp.eq.s32.totalorder %s1882_s14, 3 }
  0x16   : > { %p887_p5 = scmp.ge.s32.totalorder %s1374_s12, 1  ;;  %p273_p7 = scmp.lt.s32.totalorder %s1374_s12, 5 }
  0x17   : > { %p1487_p4 = por %p1884_p1, %p66_p0  ;;  %p1492_p6 = por %p210_p3, %p66_p0 }
  0x18   : > { %p1497_p8 = pnand %p887_p5, %p273_p7  ;;  %s1376_s18 = smov [#allocation7]  }
  0x19   : > { %s1907_s15 = scalar_select %p1487_p4, 1, 0 }
  0x1a   : > { %s1908_s16 = scalar_select %p1492_p6, 1, 0 }
  0x1b   : > { %s1910_s17 = scalar_select %p1497_p8, 1, 0 }
  0x1c   : > { %1909 = sst [smem:[#allocation21_spill]] %s1908_s16  ;;  %s285_s19 = sshll.u32 %s1376_s18, 4  ;;  %s286_s19 = int_to_ptr.vmem [resolvable:$true] %s285_s19 }
  0x1d   : > { %p979_p9 = pneg %p1497_p8  ;;  %s1377_s21 = smov [#allocation8]  }
  0x1e   : > { %s301_s22 = sshll.u32 %s1377_s21, 4  ;;  %s1912_s2 = sld [smem:[#allocation24_spill]]  ;;  %s1509_s22 = int_to_ptr.vmem [resolvable:$true] %s301_s22 }
  0x1f   : > { %p1505_p10 = pnand %p979_p9, %p1884_p1 }
  0x21   : > { %p1090_p12 = pneg %p1505_p10 }
  0x24   : > { %s1088_s25 = scalar_lea.hbm %s1912_s2, 256 }
  0x25   : > { %p1089_p11 = scmp.ne.s32.totalorder %s1912_s2, %s1088_s25  ;;  %p1095_p3 = scmp.lt.u32.totalorder %s1088_s25, %s1912_s2 }
  0x27   : > { %p1091_p13 = pnand %p1090_p12, %p1089_p11 }
  0x29   : > { %p1092_p0 = pneg %p1091_p13 }
  0x2b   : > { %p1097_p5 = pnand %p1095_p3, %p1092_p0 }
  0x2d   : > { %1100 = shalt.err (!%p1097_p5)
}
  0x2e   : > { %s1101_s21 = scalar_lea.vmem %s286_s19, 256  ;;  %p1109_p2 = scmp.lt.s32.totalorder %s286_s19, %s286_s19 }
  0x2f   : > { %p1102_p7 = scmp.ne.s32.totalorder %s286_s19, %s1101_s21  ;;  %p1110_p6 = scmp.lt.s32.totalorder %s1101_s21, %s1101_s21 }
  0x31   : > { %p1104_p9 = pnand %p1102_p7, %p1090_p12  ;;  %p1111_p4 = por %p1110_p6, %p1109_p2 }
  0x33   : > { %p1105_p1 = pneg %p1104_p9 }
  0x35   : > { %p1112_p8 = pnand %p1111_p4, %p1105_p1 }
  0x37   : > { %1115 = shalt.err (!%p1112_p8)
}
  0x38   : > { %s1890_s23 = smov 64   ;;  %s1892_s24 = smov 4  }
  0x39   : > { %982 = dma.hbm_to_vmem [thread:$0]  (!%p1505_p10), %s1912_s2, 256, %s286_s19, [#allocation6], %s1890_s23, %s1890_s23, %s1892_s24  }
  0x3a   : > { %s1913_s4 = sld [smem:[#allocation25_spill]] }
  0x40   : > { %s1116_s18 = scalar_lea.hbm %s1913_s4, 256 }
  0x41   : > { %p1117_p1 = scmp.ne.s32.totalorder %s1913_s4, %s1116_s18  ;;  %p1123_p6 = scmp.lt.u32.totalorder %s1116_s18, %s1913_s4 }
  0x43   : > { %p1119_p2 = pnand %p1117_p1, %p1090_p12 }
  0x45   : > { %p1120_p4 = pneg %p1119_p2 }
  0x47   : > { %p1125_p8 = pnand %p1123_p6, %p1120_p4 }
  0x49   : > { %1128 = shalt.err (!%p1125_p8)
}
  0x4a   : > { %s1129_s19 = scalar_lea.vmem %s1509_s22, 256  ;;  %p1137_p3 = scmp.lt.s32.totalorder %s1509_s22, %s1509_s22 }
  0x4b   : > { %p1130_p11 = scmp.ne.s32.totalorder %s1509_s22, %s1129_s19  ;;  %p1138_p5 = scmp.lt.s32.totalorder %s1129_s19, %s1129_s19 }
  0x4d   : > { %p1132_p13 = pnand %p1130_p11, %p1090_p12  ;;  %p1139_p7 = por %p1138_p5, %p1137_p3 }
  0x4f   : > { %p1133_p0 = pneg %p1132_p13 }
  0x51   : > { %p1140_p9 = pnand %p1139_p7, %p1133_p0 }
  0x53   : > { %1143 = shalt.err (!%p1140_p9)
}
  0x54   : > { %985 = dma.hbm_to_vmem [thread:$0]  (!%p1505_p10), %s1913_s4, 256, %s1509_s22, [#allocation9], %s1890_s23, %s1890_s23, %s1892_s24  }
  0x55   : > { %s41_s27 = sadd.s32 1, %s1366_s10  ;;  %s44_s20 = sadd.s32 1, %s1370_s11 }
  0x56   : > { %p42_p12 = scmp.ge.s32.totalorder %s41_s27, 2  ;;  %s53_s14 = sadd.s32 1, %s1354_s29 }
  0x57   : > { %p60_p1 = scmp.ne.s32.totalorder %s1354_s29, %s1350_s28  ;;  %p61_p2 = scmp.eq.s32.totalorder %s1374_s12, 0 }
  0x58   : > { %s1948_s27 = smov (%p42_p12, %s41_s27), 0  ;;  %s1950_s20 = smov (!%p42_p12, %s44_s20), %s1370_s11 }
  0x59   : > { %1914 = sst [smem:[#allocation22_spill]] %s1948_s27  ;;  %s49_s16 = ssub.s32 %s1366_s10, %s1948_s27 }
  0x5a   : > { %p1575_p4 = por %p61_p2, %p60_p1  ;;  %p46_p10 = scmp.ge.s32.totalorder %s1950_s20, 2 }
  0x5b   : > { %p1916_p6 = scmp.eq.s32.totalorder %s1476_s13, 3  ;;  %p1005_p11 = scmp.lt.s32.totalorder %s1374_s12, 4 }
  0x5c   : > { %s318_s26 = sand.u32 1, %s1354_s29   ;;  %s1952_s20 = smov (%p46_p10, %s1950_s20), 0 }
  0x5d   : > { %p1581_p8 = por %p1916_p6, %p60_p1  ;;  %s891_s18 = sshll.u32 %s318_s26, 3 }
  0x5e   : > { %s48_s21 = ssub.s32 %s1370_s11, %s1952_s20  ;;  %s892_s7 = sshll.u32 %s1366_s10, 1 }
  0x5f   : > { %s1917_s22 = scalar_select %p1581_p8, 1, 0 }
  0x60   : > { %s50_s19 = sor.u32 %s49_s16, %s48_s21  ;;  %s893_s8 = sshll.u32 %s1370_s11, 2 }
  0x61   : > { %1918 = sst [smem:[#allocation23_spill]] %s1917_s22  ;;  %p51_p13 = scmp.eq.s32.totalorder %s50_s19, 0 }
  0x62   : > { %s328_s23 = sadd.s32 %s893_s8, %s892_s7  ;;  %s322_s24 = scalar_lea.vmem [#allocation2], %s891_s18 }
  0x63   : > { %s331_s2 = sshll.u32 %s322_s24, 4  ;;  %s894_s27 = sshll.u32 %s328_s23, 6  ;;  %s1596_s2 = int_to_ptr.vmem [resolvable:$true] %s331_s2 }
  0x64   : > { %s1594_s4 = scalar_select %p51_p13, %s1354_s29, %s53_s14  }
  0x65   : > { %s1601_s5 = scalar_lea.hbm %s1873_s0, %s894_s27  ;;  %p1607_p0 = pnand %p1005_p11, %p1575_p4 }
  0x66   : > { %s1614_s23 = scalar_lea.hbm %s1874_s1, %s894_s27  ;;  %s345_s6 = scalar_lea.vmem [#allocation5], %s891_s18 }
  0x67   : > { %s1616_s22 = sshll.u32 %s345_s6, 4  ;;  %s1618_s25 = scalar_lea.sflag [#allocation3], %s318_s26  ;;  %s1650_s22 = int_to_ptr.vmem [resolvable:$true] %s1616_s22 }
  0x68   : > { %s1144_s21 = scalar_lea.hbm %s1601_s5, 128  ;;  %p1146_p5 = pneg %p1607_p0 }
  0x69   : > { %p1145_p3 = scmp.ne.s32.totalorder %s1601_s5, %s1144_s21  ;;  %s1149_s8 = scalar_lea.hbm %s1873_s0, 512 }
  0x6a   : > { %p1150_p12 = scmp.lt.u32.totalorder %s1601_s5, %s1873_s0  ;;  %p1151_p1 = scmp.lt.u32.totalorder %s1149_s8, %s1144_s21 }
  0x6b   : > { %p1147_p7 = pnand %p1146_p5, %p1145_p3  ;;  %p1153_p4 = scmp.lt.u32.totalorder %s1144_s21, %s1601_s5 }
  0x6c   : > { %p1152_p2 = por %p1151_p1, %p1150_p12 }
  0x6d   : > { %p1148_p9 = pneg %p1147_p7 }
  0x6e   : > { %p1154_p10 = por %p1153_p4, %p1152_p2 }
  0x70   : > { %p1155_p6 = pnand %p1154_p10, %p1148_p9 }
  0x72   : > { %1158 = shalt.err (!%p1155_p6)
}
  0x73   : > { %s1159_s26 = scalar_lea.vmem %s1596_s2, 128  ;;  %s1380_s18 = smov [#allocation2]  }
  0x74   : > { %p1160_p11 = scmp.ne.s32.totalorder %s1596_s2, %s1159_s26  ;;  %s1164_s14 = sshll.u32 %s1380_s18, 4  ;;  %s1165_s14 = int_to_ptr.vmem [resolvable:$false] %s1164_s14 }
  0x75   : > { %s1166_s6 = scalar_lea.vmem %s1165_s14, 256  ;;  %p1167_p7 = scmp.lt.s32.totalorder %s1596_s2, %s1165_s14 }
  0x76   : > { %p1162_p13 = pnand %p1160_p11, %p1146_p5  ;;  %p1168_p12 = scmp.lt.s32.totalorder %s1166_s6, %s1159_s26 }
  0x78   : > { %p1163_p3 = pneg %p1162_p13  ;;  %p1169_p1 = por %p1168_p12, %p1167_p7 }
  0x7a   : > { %p1170_p2 = pnand %p1169_p1, %p1163_p3 }
  0x7c   : > { %1173 = shalt.err (!%p1170_p2)
}
  0x7d   : > { %s1920_s21 = smov 4   ;;  %s1921_s19 = smov 64  }
  0x7e   : > { %989 = dma.hbm_to_vmem [thread:$0]  (!%p1607_p0), %s1601_s5, 128, %s1596_s2, %s1618_s25, %s1921_s19, %s1921_s19, %s1920_s21  }
  0x7f   : > { %s341_s7 = sand.u32 1, %s1374_s12   ;;  %s1174_s24 = scalar_lea.hbm %s1614_s23, 128 }
  0x80   : > { %s1653_s8 = scalar_lea.sflag [#allocation6], %s341_s7  ;;  %p1175_p9 = scmp.ne.s32.totalorder %s1614_s23, %s1174_s24 }
  0x81   : > { %s1179_s18 = scalar_lea.hbm %s1874_s1, 512  ;;  %p1180_p6 = scmp.lt.u32.totalorder %s1614_s23, %s1874_s1 }
  0x82   : > { %p1177_p4 = pnand %p1175_p9, %p1146_p5  ;;  %p1181_p11 = scmp.lt.u32.totalorder %s1179_s18, %s1174_s24 }
  0x83   : > { %p1183_p3 = scmp.lt.u32.totalorder %s1174_s24, %s1614_s23 }
  0x84   : > { %p1178_p10 = pneg %p1177_p4  ;;  %p1182_p13 = por %p1181_p11, %p1180_p6 }
  0x86   : > { %p1184_p7 = por %p1183_p3, %p1182_p13 }
  0x88   : > { %p1185_p12 = pnand %p1184_p7, %p1178_p10 }
  0x8a   : > { %1188 = shalt.err (!%p1185_p12)
}
  0x8b   : > { %s1189_s2 = scalar_lea.vmem %s1650_s22, 128  ;;  %s1381_s5 = smov [#allocation5]  }
  0x8c   : > { %p1190_p1 = scmp.ne.s32.totalorder %s1650_s22, %s1189_s2  ;;  %s1194_s25 = sshll.u32 %s1381_s5, 4  ;;  %s1195_s25 = int_to_ptr.vmem [resolvable:$false] %s1194_s25 }
  0x8d   : > { %s1196_s7 = scalar_lea.vmem %s1195_s25, 256  ;;  %p1197_p4 = scmp.lt.s32.totalorder %s1650_s22, %s1195_s25 }
  0x8e   : > { %p1192_p2 = pnand %p1190_p1, %p1146_p5  ;;  %p1198_p6 = scmp.lt.s32.totalorder %s1196_s7, %s1189_s2 }
  0x90   : > { %p1193_p9 = pneg %p1192_p2  ;;  %p1199_p11 = por %p1198_p6, %p1197_p4 }
  0x92   : > { %p1200_p13 = pnand %p1199_p11, %p1193_p9 }
  0x94   : > { %1203 = shalt.err (!%p1200_p13)
}
  0x95   : > { %992 = dma.hbm_to_vmem [thread:$0]  (!%p1607_p0), %s1614_s23, 128, %s1650_s22, %s1653_s8, %s1921_s19, %s1921_s19, %s1920_s21  }
  0x96   : > { %p1922_p5 = scmp.ne.s32.totalorder %s1910_s17, 0 }
  0x97   : > { %s1685_s24 = sand.u32 (!%p1922_p5), 1, %s1350_s28   ;;  %p1923_p10 = scmp.ne.s32.totalorder (!%p1922_p5), %s1907_s15, 0 }
  0x98   : > { %366 = sbr.rel (%p1922_p5) target bundleno = 562 (0x232), region = 44  ;;  %s1688_s27 = sshll.u32 (!%p1922_p5), %s1685_s24, 3 }
  0x99   : > { %s369_s16 = scalar_lea.sflag (!%p1922_p5), [#allocation3], %s1685_s24  ;;  %s372_s26 = scalar_lea.vmem (!%p1922_p5), [#allocation2], %s1688_s27 }
  0x9f   : > { %1321 = dma.done.wait (%p1923_p10), %s369_s16, 128  }
  0xa0   : > { %1323 = vsyncadd (%p1923_p10), %s369_s16, 4294967168  ;;  %s377_s17 = sand.u32 1, %s1476_s13   ;;  %s381_s22 = scalar_lea.vmem [#allocation5], %s1688_s27 }
  0xa1   : > { %s378_s23 = scalar_lea.sflag [#allocation6], %s377_s17 }
  0xa2   : > { %1325 = dma.done.wait (%p1923_p10), %s378_s23, 128  }
  0xa3   : > { %1327 = vsyncadd (%p1923_p10), %s378_s23, 4294967168  ;;  %p1924_p0 = scmp.eq.s32.totalorder %s1476_s13, 0 }
  0xa5   : > { %1329 = dma.done.wait (%p1924_p0), [#allocation6], 256   ;;  %p1925_p3 = pmov %p1924_p0 }
  0xa6   : > { %p1926_p7 = pmov %p1924_p0 }
  0xa7   : > { %1331 = vsyncadd (%p1925_p3), [#allocation6], 4294967040 }
  0xa8   : > { %1333 = dma.done.wait (%p1926_p7), [#allocation9], 256   ;;  %p1927_p12 = pmov %p1924_p0 }
  0xa9   : > { %v1382_v0 = vmov 0.0   ;;  %vm1383_vm0 = vmmov 0   ;;  %v1082_v1 = vld [vmem:[#allocation7] sm:$0xff]   ;;  %v1083_v2 = vld [vmem:[#allocation7 + $0x8] sm:$0xff]   ;;  %v1085_v3 = vld [vmem:[#allocation8] sm:$0xff]   ;;  %vm473_vm1 = vcmask 261120  }
  0xaa   : > { %1335 = vsyncadd (%p1927_p12), [#allocation9], 4294967040  ;;  %945 = vmatprep.subr.bf16.mxu0 %v1382_v0  ;;  %949 = vmatprep.mubr.msk.bf16.mxu0 %vm1383_vm0, %v1382_v0  ;;  %v1084_v4 = vld [vmem:[%s372_s26] sm:$0xff]   ;;  %v1086_v5 = vld [vmem:[#allocation8 + $0x8] sm:$0xff]   ;;  %s924_s15 = sshll.u32 %s1358_s30, 1  ;;  %s925_s21 = sshll.u32 %s1362_s9, 2 }
  0xab   : > { %953 = vmatprep.subr.bf16.mxu1 %v1382_v0  ;;  %957 = vmatprep.mubr.msk.bf16.mxu1 %vm1383_vm0, %v1382_v0  ;;  %v1087_v6 = vld [vmem:[%s381_s22] sm:$0xff]   ;;  %v907_v7 = vld [vmem:[%s1876_s3] ss:$0 sm:$0xff]  ;;  %s644_s18 = sadd.s32 %s925_s21, %s924_s15  ;;  %s1928_s2 = sld [smem:[#allocation26_spill]]  ;;  %vm600_vm2 = vcmask 257024  }
  0xac   : > { %946 = vmatpush3.bf16.msra.mxu0 %v1082_v1  ;;  %954 = vmatpush3.bf16.msra.mxu1 %v1085_v3  ;;  %s422_s5 = scalar_lea.vmem [#allocation10], %s1688_s27  ;;  %s1721_s7 = sshll.u32 %s644_s18, 6 }
  0xad   : > { %947 = vmatprep.subr.bf16.mxu0 %v1382_v0  ;;  %955 = vmatprep.subr.bf16.mxu1 %v1382_v0  ;;  %s647_s25 = sshll.u32 %s422_s5, 4  ;;  %s1384_s9 = smov 96   ;;  %s1731_s25 = int_to_ptr.vmem [resolvable:$true] %s647_s25 }
  0xae   : > { %s1930_s23 = sld [smem:[#allocation27_spill]]  ;;  %s1735_s15 = scalar_lea.vmem [#allocation13], %s1688_s27 }
  0xaf   : > { %s622_s21 = scalar_lea.sflag [#allocation4], %s1685_s24  ;;  %s1204_s19 = scalar_lea.vmem %s1731_s25, 128 }
  0xb0   : > { %948 = vmatpush3.bf16.msra.mxu0 %v1083_v2  ;;  %956 = vmatpush3.bf16.msra.mxu1 %v1086_v5  ;;  %p1205_p1 = scmp.ne.s32.totalorder %s1731_s25, %s1204_s19  ;;  %s1385_s8 = smov [#allocation10]  }
  0xb1   : > { %v912_v11 = vld [vmem:[%s1928_s2] ss:$0 sm:$0xff]  ;;  %s1208_s18 = sshll.u32 %s1385_s8, 4  ;;  %s1209_s18 = int_to_ptr.vmem [resolvable:$false] %s1208_s18 }
  0xb2   : > { %p1206_p2 = pnand %p1205_p1, %p1581_p8  ;;  %s1210_s14 = scalar_lea.vmem %s1209_s18, 256 }
  0xb3   : > { %950 = vmatmul.mubr.msk.bf16.vlgmr.msra.gmra.mrb[0].mxu0 %vm473_vm1, %v1084_v4  ;;  %958 = vmatmul.mubr.msk.bf16.vlgmr.msra.gmra.mrb[0].mxu1 %vm473_vm1, %v1087_v6  ;;  %p1211_p4 = scmp.lt.s32.totalorder %s1731_s25, %s1209_s18  ;;  %p1212_p6 = scmp.lt.s32.totalorder %s1210_s14, %s1204_s19 }
  0xb4   : > { %s1729_s22 = scalar_lea.hbm %s1930_s23, %s1721_s7  ;;  %p1207_p9 = pneg %p1206_p2 }
  0xb5   : > { %p1213_p11 = por %p1212_p6, %p1211_p4 }
  0xb7   : > { %p1214_p13 = pnand %p1213_p11, %p1207_p9 }
 0x186   : > { %v511_v8 = vpop.f32.mrb[0].mxu0  ;;  %v585_v16 = vpop.f32.mrb[0].mxu1 }
 0x187   : > { %v512_v9 = vadd.f32 %v907_v7, %v511_v8  ;;  %v951_v10 = vpop.f32.mrb[1].mxu0  ;;  %v586_v17 = vadd.f32 %v912_v11, %v585_v16  ;;  %v959_v18 = vpop.f32.mrb[1].mxu1 }
 0x188   : > { %v514_v12 = vpop.f32.mrb[2].mxu0  ;;  %v588_v20 = vpop.f32.mrb[2].mxu1 }
 0x189   : > { %v935_v13 = vpack.c.bf16 %v512_v9, %v512_v9  ;;  %v515_v14 = vadd.f32 %v907_v7, %v514_v12  ;;  %v952_v15 = vpop.f32.mrb[3].mxu0  ;;  %v937_v21 = vpack.c.bf16 %v586_v17, %v586_v17  ;;  %v589_v22 = vadd.f32 %v912_v11, %v588_v20  ;;  %v960_v23 = vpop.f32.mrb[3].mxu1 }
 0x18b   : > { %601 = vst.msk [vmem:[%s422_s5] sm:$0xf] %vm600_vm2, %v935_v13  ;;  %v936_v19 = vpack.c.bf16 %v515_v14, %v515_v14  ;;  %603 = vrot.lane.b32.xlu0 %v935_v13, %s1384_s9  ;;  %619 = vst.msk [vmem:[%s1735_s15] sm:$0xf] %vm600_vm2, %v937_v21  ;;  %v938_v24 = vpack.c.bf16 %v589_v22, %v589_v22 }
 0x18d   : > { %602 = vst.msk [vmem:[%s422_s5 + $0x4] sm:$0xf] %vm600_vm2, %v936_v19 }
 0x18e   : > { %1217 = shalt.err (!%p1214_p13)
}
 0x18f   : > { %s1218_s6 = scalar_lea.hbm %s1729_s22, 128  ;;  %s1222_s16 = scalar_lea.hbm %s1930_s23, 512 }
 0x190   : > { %p1219_p5 = scmp.ne.s32.totalorder %s1729_s22, %s1218_s6  ;;  %p1223_p3 = scmp.lt.u32.totalorder %s1729_s22, %s1930_s23 }
 0x191   : > { %p1224_p7 = scmp.lt.u32.totalorder %s1222_s16, %s1218_s6  ;;  %p1226_p1 = scmp.lt.u32.totalorder %s1218_s6, %s1729_s22 }
 0x192   : > { %p1220_p10 = pnand %p1219_p5, %p1581_p8 }
 0x193   : > { %p1225_p12 = por %p1224_p7, %p1223_p3 }
 0x194   : > { %p1221_p0 = pneg %p1220_p10 }
 0x195   : > { %p1227_p2 = por %p1226_p1, %p1225_p12 }
 0x197   : > { %p1228_p9 = pnand %p1227_p2, %p1221_p0 }
 0x199   : > { %1231 = shalt.err (!%p1228_p9)
}
 0x19a   : > { %s1898_s19 = smov 64   ;;  %s1387_s18 = smov 4   ;;  %605 = vrot.lane.b32.xlu0 %v936_v19, %s1384_s9  ;;  %620 = vst.msk [vmem:[%s1735_s15 + $0x4] sm:$0xf] %vm600_vm2, %v938_v24 }
 0x19b   : > { %973 = dma.vmem_to_hbm [thread:$0]  (%p1581_p8), %s1731_s25, 128, %s1729_s22, %s622_s21, %s1898_s19, %s1898_s19, %s1387_s18  }
 0x19c   : > { %s429_s14 = scalar_lea.vmem [#allocation11], %s1688_s27  ;;  %s683_s2 = sshll.u32 %s1735_s15, 4  ;;  %s1780_s2 = int_to_ptr.vmem [resolvable:$true] %s683_s2 }
 0x19d   : > { %s665_s6 = sshll.u32 %s429_s14, 4  ;;  %s1931_s26 = sld [smem:[#allocation28_spill]]  ;;  %s1772_s6 = int_to_ptr.vmem [resolvable:$true] %s665_s6 }
 0x19e   : > { %s1932_s9 = sld [smem:[#allocation29_spill]]  ;;  %s1791_s15 = scalar_lea.sflag [#allocation12], %s377_s17 }
 0x19f   : > { %s1232_s8 = scalar_lea.vmem %s1772_s6, 128  ;;  %s1388_s5 = smov [#allocation11]  }
 0x1a0   : > { %p1233_p4 = scmp.ne.s32.totalorder %s1772_s6, %s1232_s8  ;;  %s1236_s16 = sshll.u32 %s1388_s5, 4  ;;  %s1237_s16 = int_to_ptr.vmem [resolvable:$false] %s1236_s16 }
 0x1a1   : > { %s1238_s19 = scalar_lea.vmem %s1237_s16, 256  ;;  %p1239_p13 = scmp.lt.s32.totalorder %s1772_s6, %s1237_s16 }
 0x1a2   : > { %p1234_p6 = pnand %p1233_p4, %p1581_p8  ;;  %p1240_p5 = scmp.lt.s32.totalorder %s1238_s19, %s1232_s8 }
 0x1a3   : > { %s1778_s24 = scalar_lea.hbm %s1931_s26, %s1721_s7 }
 0x1a4   : > { %s1933_s22 = smov %s1932_s9  ;;  %s1786_s21 = scalar_lea.hbm %s1932_s9, %s1721_s7 }
 0x1a5   : > { %p1235_p11 = pneg %p1234_p6  ;;  %p1241_p10 = por %p1240_p5, %p1239_p13 }
 0x1a7   : > { %p1242_p0 = pnand %p1241_p10, %p1235_p11 }
 0x1fd   : > { %v604_v25 = vpop.permute.xlu0 %603 }
 0x1fe   : > { %609 = vst.msk [vmem:[%s429_s14] sm:$0xf] %vm600_vm2, %v604_v25 }
 0x20c   : > { %v606_v26 = vpop.permute.xlu0 %605 }
 0x20d   : > { %610 = vst.msk [vmem:[%s429_s14 + $0x4] sm:$0xf] %vm600_vm2, %v606_v26 }
 0x20e   : > { %1245 = shalt.err (!%p1242_p0)
}
 0x20f   : > { %s1246_s13 = scalar_lea.hbm %s1778_s24, 128  ;;  %s1250_s14 = scalar_lea.hbm %s1931_s26, 512 }
 0x210   : > { %p1247_p3 = scmp.ne.s32.totalorder %s1778_s24, %s1246_s13  ;;  %p1251_p1 = scmp.lt.u32.totalorder %s1778_s24, %s1931_s26 }
 0x211   : > { %p1252_p2 = scmp.lt.u32.totalorder %s1250_s14, %s1246_s13  ;;  %p1254_p4 = scmp.lt.u32.totalorder %s1246_s13, %s1778_s24 }
 0x212   : > { %p1248_p7 = pnand %p1247_p3, %p1581_p8 }
 0x213   : > { %p1253_p9 = por %p1252_p2, %p1251_p1 }
 0x214   : > { %p1249_p12 = pneg %p1248_p7 }
 0x215   : > { %p1255_p6 = por %p1254_p4, %p1253_p9 }
 0x217   : > { %p1256_p11 = pnand %p1255_p6, %p1249_p12 }
 0x219   : > { %1259 = shalt.err (!%p1256_p11)
}
 0x21a   : > { %s1934_s19 = smov 64   ;;  %s1260_s9 = scalar_lea.vmem %s1780_s2, 128 }
 0x21b   : > { %974 = dma.vmem_to_hbm [thread:$0]  (%p1581_p8), %s1772_s6, 128, %s1778_s24, %s1791_s15, %s1934_s19, %s1934_s19, %s1387_s18  }
 0x21c   : > { %p1261_p13 = scmp.ne.s32.totalorder %s1780_s2, %s1260_s9  ;;  %s1389_s8 = smov [#allocation13]  }
 0x21d   : > { %s1264_s5 = sshll.u32 %s1389_s8, 4  ;;  %s1265_s5 = int_to_ptr.vmem [resolvable:$false] %s1264_s5 }
 0x21e   : > { %p1262_p5 = pnand %p1261_p13, %p1581_p8  ;;  %s1266_s16 = scalar_lea.vmem %s1265_s5, 256 }
 0x21f   : > { %p1267_p0 = scmp.lt.s32.totalorder %s1780_s2, %s1265_s5  ;;  %p1268_p3 = scmp.lt.s32.totalorder %s1266_s16, %s1260_s9 }
 0x220   : > { %p1263_p10 = pneg %p1262_p5 }
 0x221   : > { %p1269_p7 = por %p1268_p3, %p1267_p0 }
 0x223   : > { %p1270_p12 = pnand %p1269_p7, %p1263_p10 }
 0x225   : > { %1273 = shalt.err (!%p1270_p12)
}
 0x226   : > { %s1274_s6 = scalar_lea.hbm %s1786_s21, 128  ;;  %s1278_s17 = scalar_lea.hbm %s1933_s22, 512 }
 0x227   : > { %p1275_p1 = scmp.ne.s32.totalorder %s1786_s21, %s1274_s6  ;;  %p1279_p4 = scmp.lt.u32.totalorder %s1786_s21, %s1933_s22 }
 0x228   : > { %p1280_p6 = scmp.lt.u32.totalorder %s1278_s17, %s1274_s6  ;;  %p1282_p13 = scmp.lt.u32.totalorder %s1274_s6, %s1786_s21 }
 0x229   : > { %p1276_p2 = pnand %p1275_p1, %p1581_p8 }
 0x22a   : > { %p1281_p11 = por %p1280_p6, %p1279_p4 }
 0x22b   : > { %p1277_p9 = pneg %p1276_p2 }
 0x22c   : > { %p1283_p5 = por %p1282_p13, %p1281_p11 }
 0x22e   : > { %p1284_p10 = pnand %p1283_p5, %p1277_p9 }
 0x230   : > { %1287 = shalt.err (!%p1284_p10)
}
 0x231   : > { %975 = dma.vmem_to_hbm [thread:$0]  (%p1581_p8), %s1780_s2, 128, %s1786_s21, %s1791_s15, %s1934_s19, %s1934_s19, %s1387_s18  }
 0x232 PF: > { %s1935_s25 = sld [smem:[#allocation20_spill]]  ;;  %s1936_s27 = sld [smem:[#allocation21_spill]] }
 0x233   : > { %p1008_p0 = scmp.ge.s32.totalorder %s1374_s12, 2 }
 0x238   : > { %s698_s9 = sand.u32 1, %s1935_s25   ;;  %p1937_p3 = scmp.ne.s32.totalorder %s1936_s27, 0 }
 0x239   : > { %s699_s8 = scalar_lea.sflag [#allocation4], %s698_s9 }
 0x23a   : > { %p994_p7 = pnand %p1008_p0, %p1937_p3 }
 0x23c   : > { %1337 = dma.done.wait (!%p994_p7), %s699_s8, 128  }
 0x23d   : > { %1339 = vsyncadd (!%p994_p7), %s699_s8, 4294967168  ;;  %s1938_s30 = sadd.s32 4294967294, %s1374_s12  }
 0x23e   : > { %s707_s5 = sand.u32 1, %s1938_s30  }
 0x23f   : > { %s708_s16 = scalar_lea.sflag [#allocation12], %s707_s5 }
 0x240   : > { %1341 = dma.done.wait (!%p994_p7), %s708_s16, 256  }
 0x241   : > { %1343 = vsyncadd (!%p994_p7), %s708_s16, 4294967040  ;;  %s32_s12 = sadd.s32 1, %s1374_s12   ;;  %s1939_s18 = sld [smem:[#allocation22_spill]] }
 0x242   : > { %p29_p8 = scmp.ge.s32.totalorder %s32_s12, 6   ;;  %s1940_s27 = smov %s1350_s28 }
 0x243   : > { %s1941_s28 = smov %s1354_s29  ;;  %s1942_s29 = smov %s1594_s4 }
 0x244   : > { %s1943_s30 = smov %s1366_s10  ;;  %s1944_s9 = smov %s1370_s11 }
 0x245   : > { %s1946_s11 = smov %s1952_s20  ;;  %31 = sbr.rel (!%p29_p8) target bundleno = 19 (0x13), region = 142 }
 0x247   : > { %s1945_s10 = smov %s1939_s18 }
 0x24c   :  { %722 = vsyncpa [#allocation3], 1 }
 0x24d   :  { %724 = vsyncpa [#allocation3 + $0x1], 1 }
 0x24e   :  { %725 = vsyncpa [#allocation6], 1 }
 0x24f   :  { %727 = vsyncpa [#allocation6 + $0x1], 1 }
 0x250   :  { %728 = vsyncpa [#allocation9], 1 }
 0x251   :  { %729 = vsyncpa [#allocation4], 1 }
 0x252   :  { %731 = vsyncpa [#allocation4 + $0x1], 1 }
 0x253   :  { %732 = vsyncpa [#allocation12], 1 }
 0x254   :  { %734 = vsyncpa [#allocation12 + $0x1], 1 }

</bundles_post_ra>
